<compile_context>
chip_gen: v5e
topology: v5e:2x2
jax: 0.10.0
libtpu: 0.0.40
codegen_flags: <defaults>
</compile_context>

<pallas_src>
import functools

import jax
import jax.numpy as jnp
from jax.experimental import pallas as pl
from jax.experimental.pallas import tpu as pltpu

LANE = 128


def skipthoughts_gather_kernel(ids_ref, emb_hbm, emb_out_ref, last_out_ref,
                               sem_emb, sem_last, *, skip_padding_dma):
    """One grid step == one block of Bblk batch rows.

    ids_ref      : (B*T,) int32 in SMEM (scalar-prefetched, flattened token ids)
    emb_hbm      : (V, D_pad) raw HBM ref (memory_space=pl.ANY, manual row DMAs)
    emb_out_ref  : (Bblk, T, D_pad) VMEM output block (gather lands here directly)
    last_out_ref : (Bblk, 1, D_pad) VMEM output block (_select_last result)
    sem_emb      : (Bblk, T) DMA semaphores
    sem_last     : (Bblk,)   DMA semaphores
    """
    Bblk, T, D_pad = emb_out_ref.shape
    base = pl.program_id(0) * (Bblk * T)
    zero_row = jnp.zeros((D_pad,), dtype=emb_out_ref.dtype)

    # ---- Phase 1: everything BEFORE any DMA wait --------------------------
    #   * read each token id exactly once from SMEM,
    #   * start one row DMA per non-padding token straight into emb_out_ref
    #     (padding rows are zero-filled with a vst, no DMA),
    #   * accumulate the padding count (_process_lengths) on the scalar path,
    #   * start one dedicated row DMA for _select_last into last_out_ref.
    pending = []  # (issue_condition or None, copy descriptor)
    for i in range(Bblk):
        n_pad = jnp.int32(0)
        for t in range(T):
            tok = ids_ref[base + i * T + t]
            n_pad = n_pad + (tok == 0).astype(jnp.int32)
            cp = pltpu.make_async_copy(emb_hbm.at[tok],
                                       emb_out_ref.at[i, t],
                                       sem_emb.at[i, t])
            if skip_padding_dma:
                is_real = tok != 0

                @pl.when(is_real)
                def _start(cp=cp):
                    cp.start()

                @pl.when(tok == 0)
                def _zero(i=i, t=t):
                    emb_out_ref[i, t, :] = zero_row

                pending.append((is_real, cp))
            else:
                cp.start()
                pending.append((None, cp))

        # _process_lengths: length = T - #zeros.
        # _select_last: row length-1; PyTorch's length==0 -> index -1 wraps to T-1.
        length = T - n_pad
        last_idx = jnp.where(length > 0, length - 1, T - 1)
        last_tok = ids_ref[base + i * T + last_idx]
        cp_last = pltpu.make_async_copy(emb_hbm.at[last_tok],
                                        last_out_ref.at[i, 0],
                                        sem_last.at[i])
        if skip_padding_dma:
            is_real = last_tok != 0

            @pl.when(is_real)
            def _start_last(cp_last=cp_last):
                cp_last.start()

            @pl.when(last_tok == 0)
            def _zero_last(i=i):
                last_out_ref[i, 0, :] = zero_row

            pending.append((is_real, cp_last))
        else:
            cp_last.start()
            pending.append((None, cp_last))

    # ---- Phase 2: wait on exactly the DMAs that were issued ---------------
    for cond, cp in pending:
        if cond is None:
            cp.wait()
        else:
            @pl.when(cond)
            def _wait(cp=cp):
                cp.wait()


def prepare_embedding_table(emb_weight, dtype=jnp.float32):
    """Pad the feature dim to a lane-dense multiple of 128 (620 -> 640) and cast.

    Call ONCE at model-init time (this is the nn.Embedding weight; it never
    changes per forward).  Doing this inside the forward would re-read and
    re-write the whole (V, 640) table through HBM on every call.
    Pass dtype=jnp.bfloat16 to halve gather/writeback HBM traffic if the
    downstream GRU tolerates bf16.
    """
    V, D = emb_weight.shape
    D_pad = ((D + LANE - 1) // LANE) * LANE
    return jnp.pad(emb_weight.astype(dtype), ((0, 0), (0, D_pad - D)))


def _pick_block_b(B, max_block=8, min_grid=2):
    """Largest divisor of B <= max_block, preferring >= min_grid grid steps so
    both v7x TensorCores get work (harmless no-op on single-TC v5e/v6e)."""
    best = 1
    for cand in range(1, min(B, max_block) + 1):
        if B % cand == 0:
            best = cand
    if B // best < min_grid:
        for cand in range(best, 0, -1):
            if B % cand == 0 and B // cand >= min_grid:
                return cand
    return best


def skipthoughts_forward(ids, emb_table_padded, *, block_b=None,
                         skip_padding_dma=True):
    """ids: (B, T) int32 token ids (0 == padding_idx).
    emb_table_padded: (V, D_pad) table from prepare_embedding_table().

    Returns:
      emb  : (B, T, D_pad) embedding lookup (feature-padded to 640; slice
             [..., :620] only in the final consumer to avoid a full re-copy).
      last : (B, D_pad)    _select_last(emb, _process_lengths(ids)).

    skip_padding_dma=True assumes table row 0 (padding_idx) is all zeros, which
    nn.Embedding(padding_idx=0) guarantees unless manually overwritten; pass
    False to always gather row 0 from HBM instead of zero-filling.
    """
    B, T = ids.shape
    V, D_pad = emb_table_padded.shape
    assert D_pad % LANE == 0
    Bblk = block_b if block_b is not None else _pick_block_b(B)
    assert B % Bblk == 0, (B, Bblk)
    dtype = emb_table_padded.dtype

    ids_flat = ids.reshape(-1).astype(jnp.int32)   # 1D -> tiny SMEM footprint

    kernel = functools.partial(skipthoughts_gather_kernel,
                               skip_padding_dma=skip_padding_dma)

    emb_out, last_out = pl.pallas_call(
        kernel,
        out_shape=(
            jax.ShapeDtypeStruct((B, T, D_pad), dtype),
            jax.ShapeDtypeStruct((B, 1, D_pad), dtype),
        ),
        grid_spec=pltpu.PrefetchScalarGridSpec(
            num_scalar_prefetch=1,                     # ids -> SMEM
            grid=(B // Bblk,),
            in_specs=[
                pl.BlockSpec(memory_space=pl.ANY),     # table stays in HBM
            ],
            out_specs=[
                pl.BlockSpec((Bblk, T, D_pad), lambda b, ids_smem: (b, 0, 0)),
                pl.BlockSpec((Bblk, 1, D_pad), lambda b, ids_smem: (b, 0, 0)),
            ],
            scratch_shapes=[
                pltpu.SemaphoreType.DMA((Bblk, T)),
                pltpu.SemaphoreType.DMA((Bblk,)),
            ],
        ),
        compiler_params=pltpu.CompilerParams(
            dimension_semantics=("parallel",)),        # megacore over batch blocks
    )(ids_flat, emb_table_padded)

    return emb_out, last_out[:, 0, :]


if __name__ == "__main__":
    key = jax.random.PRNGKey(0)
    k_emb, k_ids = jax.random.split(key)

    # Synthetic "vocab" of 23 words -> table has len(vocab)+1 = 24 rows, dim 620.
    vocab_size = 23
    V = vocab_size + 1
    D = 620
    B, T = 2, 8

    # Deterministic embedding table; padding_idx=0 row is zeros (as nn.Embedding).
    emb_weight = jax.random.normal(k_emb, (V, D), dtype=jnp.float32)
    emb_weight = emb_weight.at[0].set(0.0)

    # Token ids in [1, V-1], zero-padded tails to give varying lengths.
    ids = jax.random.randint(k_ids, (B, T), 1, V, dtype=jnp.int32)
    lengths = jnp.array([5, 8], dtype=jnp.int32)
    pos = jnp.arange(T, dtype=jnp.int32)[None, :]
    ids = jnp.where(pos < lengths[:, None], ids, 0)

    # Model init (ONCE): pad the table to lane-dense width.
    emb_table = prepare_embedding_table(emb_weight, dtype=jnp.float32)

    emb_out, last_out = skipthoughts_forward(ids, emb_table)
    jax.block_until_ready((emb_out, last_out))

    # Reference check in plain JAX.
    D_pad = emb_table.shape[1]
    emb_ref = emb_weight[ids]                                   # (B, T, D)
    ref_lengths = T - jnp.sum(ids == 0, axis=1)
    last_ref = emb_ref[jnp.arange(B), ref_lengths - 1]          # (B, D)

    assert emb_out.shape == (B, T, D_pad) and last_out.shape == (B, D_pad)
    assert jnp.allclose(emb_out[..., :D], emb_ref, atol=1e-6)
    assert jnp.allclose(emb_out[..., D:], 0.0)
    assert jnp.allclose(last_out[..., :D], last_ref, atol=1e-6)
    assert jnp.allclose(last_out[..., D:], 0.0)

    print("KERNEL_OK")
</pallas_src>

<mosaic_0001>
module attributes {stable_mosaic.version = 11 : i64} {
  func.func @skipthoughts_gather_kernel(%arg0: i32, %arg1: memref<16xi32, #tpu.memory_space<smem>>, %arg2: memref<24x640xf32, #tpu.memory_space<any>>, %arg3: memref<1x8x640xf32, #tpu.memory_space<vmem>>, %arg4: memref<1x1x640xf32, #tpu.memory_space<vmem>>, %arg5: memref<1x8x!tpu.dma_semaphore, #tpu.memory_space<semaphore_mem>>, %arg6: memref<1x!tpu.dma_semaphore, #tpu.memory_space<semaphore_mem>>) attributes {dimension_semantics = [#tpu.dimension_semantics<parallel>], iteration_bounds = array<i64: 2>, scalar_prefetch = 1 : i64, scratch_operands = 2 : i64, tpu.core_type = #tpu.core_type<tc>, window_params = [{}, {transform_indices = @transform_1, window_bounds = array<i64: 1, 8, 640>}, {transform_indices = @transform_2, window_bounds = array<i64: 1, 1, 640>}]} {
    %c8_i32 = arith.constant 8 : i32
    %0 = arith.muli %arg0, %c8_i32 : i32
    %cst = arith.constant 0.000000e+00 : f32
    %1 = vector.broadcast %cst : f32 to vector<640xf32>
    %c0_i32 = arith.constant 0 : i32
    %2 = arith.addi %0, %c0_i32 : i32
    %c0_i32_0 = arith.constant 0 : i32
    %3 = arith.addi %2, %c0_i32_0 : i32
    %4 = arith.index_cast %3 : i32 to index
    %5 = memref.load %arg1[%4] : memref<16xi32, #tpu.memory_space<smem>>
    %c0_i32_1 = arith.constant 0 : i32
    %6 = arith.cmpi eq, %5, %c0_i32_1 : i32
    %7 = arith.extui %6 : i1 to i32
    %c0_i32_2 = arith.constant 0 : i32
    %8 = arith.addi %c0_i32_2, %7 : i32
    %c0_i32_3 = arith.constant 0 : i32
    %9 = arith.cmpi ne, %5, %c0_i32_3 : i32
    %10 = arith.extui %9 : i1 to i32
    %c0_i32_4 = arith.constant 0 : i32
    %c0_i32_5 = arith.constant 0 : i32
    %c0_i32_6 = arith.constant 0 : i32
    %c0_i32_7 = arith.constant 0 : i32
    %c0_i32_8 = arith.constant 0 : i32
    %11 = arith.cmpi ne, %10, %c0_i32_8 : i32
    scf.if %11 {
      %c0_i32_137 = arith.constant 0 : i32
      %138 = tpu.memref_slice %arg2[%5, %c0_i32_137] : memref<24x640xf32, #tpu.memory_space<any>> -> memref<1x640xf32, #tpu.memory_space<any>>
      %139 = tpu.memref_squeeze %138 : memref<1x640xf32, #tpu.memory_space<any>> -> memref<640xf32, #tpu.memory_space<any>>
      %c0_i32_138 = arith.constant 0 : i32
      %140 = tpu.memref_slice %arg3[%c0_i32_4, %c0_i32_5, %c0_i32_138] : memref<1x8x640xf32, #tpu.memory_space<vmem>> -> memref<1x1x640xf32, #tpu.memory_space<vmem>>
      %141 = tpu.memref_squeeze %140 : memref<1x1x640xf32, #tpu.memory_space<vmem>> -> memref<640xf32, #tpu.memory_space<vmem>>
      %142 = tpu.memref_slice %arg5[%c0_i32_6, %c0_i32_7] : memref<1x8x!tpu.dma_semaphore, #tpu.memory_space<semaphore_mem>> -> memref<1x1x!tpu.dma_semaphore, #tpu.memory_space<semaphore_mem>>
      %143 = tpu.memref_squeeze %142 : memref<1x1x!tpu.dma_semaphore, #tpu.memory_space<semaphore_mem>> -> memref<!tpu.dma_semaphore, #tpu.memory_space<semaphore_mem>>
      tpu.enqueue_dma source(%139 : memref<640xf32, #tpu.memory_space<any>>) target(%141 : memref<640xf32, #tpu.memory_space<vmem>>) target_semaphore(%143 : memref<!tpu.dma_semaphore, #tpu.memory_space<semaphore_mem>>)
    } else {
    }
    %c0_i32_9 = arith.constant 0 : i32
    %12 = arith.cmpi eq, %5, %c0_i32_9 : i32
    %13 = arith.extui %12 : i1 to i32
    %c0_i32_10 = arith.constant 0 : i32
    %14 = arith.cmpi ne, %13, %c0_i32_10 : i32
    scf.if %14 {
      %c0 = arith.constant 0 : index
      %c0_137 = arith.constant 0 : index
      %c0_138 = arith.constant 0 : index
      %138 = vector.load %arg3[%c0, %c0_137, %c0_138] : memref<1x8x640xf32, #tpu.memory_space<vmem>>, vector<1x1x640xf32>
      %139 = vector.shape_cast %138 : vector<1x1x640xf32> to vector<640xf32>
      %140 = vector.shape_cast %1 : vector<640xf32> to vector<1x1x640xf32>
      tpu.vector_store %arg3[%c0, %c0_137, %c0_138], %140 {strides = array<i32>} : memref<1x8x640xf32, #tpu.memory_space<vmem>>, vector<1x1x640xf32>,
    } else {
    }
    %c0_i32_11 = arith.constant 0 : i32
    %15 = arith.addi %0, %c0_i32_11 : i32
    %c1_i32 = arith.constant 1 : i32
    %16 = arith.addi %15, %c1_i32 : i32
    %17 = arith.index_cast %16 : i32 to index
    %18 = memref.load %arg1[%17] : memref<16xi32, #tpu.memory_space<smem>>
    %c0_i32_12 = arith.constant 0 : i32
    %19 = arith.cmpi eq, %18, %c0_i32_12 : i32
    %20 = arith.extui %19 : i1 to i32
    %21 = arith.addi %8, %20 : i32
    %c0_i32_13 = arith.constant 0 : i32
    %22 = arith.cmpi ne, %18, %c0_i32_13 : i32
    %23 = arith.extui %22 : i1 to i32
    %c0_i32_14 = arith.constant 0 : i32
    %c1_i32_15 = arith.constant 1 : i32
    %c0_i32_16 = arith.constant 0 : i32
    %c1_i32_17 = arith.constant 1 : i32
    %c0_i32_18 = arith.constant 0 : i32
    %24 = arith.cmpi ne, %23, %c0_i32_18 : i32
    scf.if %24 {
      %c0_i32_137 = arith.constant 0 : i32
      %138 = tpu.memref_slice %arg2[%18, %c0_i32_137] : memref<24x640xf32, #tpu.memory_space<any>> -> memref<1x640xf32, #tpu.memory_space<any>>
      %139 = tpu.memref_squeeze %138 : memref<1x640xf32, #tpu.memory_space<any>> -> memref<640xf32, #tpu.memory_space<any>>
      %c0_i32_138 = arith.constant 0 : i32
      %140 = tpu.memref_slice %arg3[%c0_i32_14, %c1_i32_15, %c0_i32_138] : memref<1x8x640xf32, #tpu.memory_space<vmem>> -> memref<1x1x640xf32, #tpu.memory_space<vmem>>
      %141 = tpu.memref_squeeze %140 : memref<1x1x640xf32, #tpu.memory_space<vmem>> -> memref<640xf32, #tpu.memory_space<vmem>>
      %142 = tpu.memref_slice %arg5[%c0_i32_16, %c1_i32_17] : memref<1x8x!tpu.dma_semaphore, #tpu.memory_space<semaphore_mem>> -> memref<1x1x!tpu.dma_semaphore, #tpu.memory_space<semaphore_mem>>
      %143 = tpu.memref_squeeze %142 : memref<1x1x!tpu.dma_semaphore, #tpu.memory_space<semaphore_mem>> -> memref<!tpu.dma_semaphore, #tpu.memory_space<semaphore_mem>>
      tpu.enqueue_dma source(%139 : memref<640xf32, #tpu.memory_space<any>>) target(%141 : memref<640xf32, #tpu.memory_space<vmem>>) target_semaphore(%143 : memref<!tpu.dma_semaphore, #tpu.memory_space<semaphore_mem>>)
    } else {
    }
    %c0_i32_19 = arith.constant 0 : i32
    %25 = arith.cmpi eq, %18, %c0_i32_19 : i32
    %26 = arith.extui %25 : i1 to i32
    %c0_i32_20 = arith.constant 0 : i32
    %27 = arith.cmpi ne, %26, %c0_i32_20 : i32
    scf.if %27 {
      %c0 = arith.constant 0 : index
      %c1 = arith.constant 1 : index
      %c0_137 = arith.constant 0 : index
      %138 = vector.load %arg3[%c0, %c1, %c0_137] : memref<1x8x640xf32, #tpu.memory_space<vmem>>, vector<1x1x640xf32>
      %139 = vector.shape_cast %138 : vector<1x1x640xf32> to vector<640xf32>
      %140 = vector.shape_cast %1 : vector<640xf32> to vector<1x1x640xf32>
      tpu.vector_store %arg3[%c0, %c1, %c0_137], %140 {strides = array<i32>} : memref<1x8x640xf32, #tpu.memory_space<vmem>>, vector<1x1x640xf32>,
    } else {
    }
    %c0_i32_21 = arith.constant 0 : i32
    %28 = arith.addi %0, %c0_i32_21 : i32
    %c2_i32 = arith.constant 2 : i32
    %29 = arith.addi %28, %c2_i32 : i32
    %30 = arith.index_cast %29 : i32 to index
    %31 = memref.load %arg1[%30] : memref<16xi32, #tpu.memory_space<smem>>
    %c0_i32_22 = arith.constant 0 : i32
    %32 = arith.cmpi eq, %31, %c0_i32_22 : i32
    %33 = arith.extui %32 : i1 to i32
    %34 = arith.addi %21, %33 : i32
    %c0_i32_23 = arith.constant 0 : i32
    %35 = arith.cmpi ne, %31, %c0_i32_23 : i32
    %36 = arith.extui %35 : i1 to i32
    %c0_i32_24 = arith.constant 0 : i32
    %c2_i32_25 = arith.constant 2 : i32
    %c0_i32_26 = arith.constant 0 : i32
    %c2_i32_27 = arith.constant 2 : i32
    %c0_i32_28 = arith.constant 0 : i32
    %37 = arith.cmpi ne, %36, %c0_i32_28 : i32
    scf.if %37 {
      %c0_i32_137 = arith.constant 0 : i32
      %138 = tpu.memref_slice %arg2[%31, %c0_i32_137] : memref<24x640xf32, #tpu.memory_space<any>> -> memref<1x640xf32, #tpu.memory_space<any>>
      %139 = tpu.memref_squeeze %138 : memref<1x640xf32, #tpu.memory_space<any>> -> memref<640xf32, #tpu.memory_space<any>>
      %c0_i32_138 = arith.constant 0 : i32
      %140 = tpu.memref_slice %arg3[%c0_i32_24, %c2_i32_25, %c0_i32_138] : memref<1x8x640xf32, #tpu.memory_space<vmem>> -> memref<1x1x640xf32, #tpu.memory_space<vmem>>
      %141 = tpu.memref_squeeze %140 : memref<1x1x640xf32, #tpu.memory_space<vmem>> -> memref<640xf32, #tpu.memory_space<vmem>>
      %142 = tpu.memref_slice %arg5[%c0_i32_26, %c2_i32_27] : memref<1x8x!tpu.dma_semaphore, #tpu.memory_space<semaphore_mem>> -> memref<1x1x!tpu.dma_semaphore, #tpu.memory_space<semaphore_mem>>
      %143 = tpu.memref_squeeze %142 : memref<1x1x!tpu.dma_semaphore, #tpu.memory_space<semaphore_mem>> -> memref<!tpu.dma_semaphore, #tpu.memory_space<semaphore_mem>>
      tpu.enqueue_dma source(%139 : memref<640xf32, #tpu.memory_space<any>>) target(%141 : memref<640xf32, #tpu.memory_space<vmem>>) target_semaphore(%143 : memref<!tpu.dma_semaphore, #tpu.memory_space<semaphore_mem>>)
    } else {
    }
    %c0_i32_29 = arith.constant 0 : i32
    %38 = arith.cmpi eq, %31, %c0_i32_29 : i32
    %39 = arith.extui %38 : i1 to i32
    %c0_i32_30 = arith.constant 0 : i32
    %40 = arith.cmpi ne, %39, %c0_i32_30 : i32
    scf.if %40 {
      %c0 = arith.constant 0 : index
      %c2 = arith.constant 2 : index
      %c0_137 = arith.constant 0 : index
      %138 = vector.load %arg3[%c0, %c2, %c0_137] : memref<1x8x640xf32, #tpu.memory_space<vmem>>, vector<1x1x640xf32>
      %139 = vector.shape_cast %138 : vector<1x1x640xf32> to vector<640xf32>
      %140 = vector.shape_cast %1 : vector<640xf32> to vector<1x1x640xf32>
      tpu.vector_store %arg3[%c0, %c2, %c0_137], %140 {strides = array<i32>} : memref<1x8x640xf32, #tpu.memory_space<vmem>>, vector<1x1x640xf32>,
    } else {
    }
    %c0_i32_31 = arith.constant 0 : i32
    %41 = arith.addi %0, %c0_i32_31 : i32
    %c3_i32 = arith.constant 3 : i32
    %42 = arith.addi %41, %c3_i32 : i32
    %43 = arith.index_cast %42 : i32 to index
    %44 = memref.load %arg1[%43] : memref<16xi32, #tpu.memory_space<smem>>
    %c0_i32_32 = arith.constant 0 : i32
    %45 = arith.cmpi eq, %44, %c0_i32_32 : i32
    %46 = arith.extui %45 : i1 to i32
    %47 = arith.addi %34, %46 : i32
    %c0_i32_33 = arith.constant 0 : i32
    %48 = arith.cmpi ne, %44, %c0_i32_33 : i32
    %49 = arith.extui %48 : i1 to i32
    %c0_i32_34 = arith.constant 0 : i32
    %c3_i32_35 = arith.constant 3 : i32
    %c0_i32_36 = arith.constant 0 : i32
    %c3_i32_37 = arith.constant 3 : i32
    %c0_i32_38 = arith.constant 0 : i32
    %50 = arith.cmpi ne, %49, %c0_i32_38 : i32
    scf.if %50 {
      %c0_i32_137 = arith.constant 0 : i32
      %138 = tpu.memref_slice %arg2[%44, %c0_i32_137] : memref<24x640xf32, #tpu.memory_space<any>> -> memref<1x640xf32, #tpu.memory_space<any>>
      %139 = tpu.memref_squeeze %138 : memref<1x640xf32, #tpu.memory_space<any>> -> memref<640xf32, #tpu.memory_space<any>>
      %c0_i32_138 = arith.constant 0 : i32
      %140 = tpu.memref_slice %arg3[%c0_i32_34, %c3_i32_35, %c0_i32_138] : memref<1x8x640xf32, #tpu.memory_space<vmem>> -> memref<1x1x640xf32, #tpu.memory_space<vmem>>
      %141 = tpu.memref_squeeze %140 : memref<1x1x640xf32, #tpu.memory_space<vmem>> -> memref<640xf32, #tpu.memory_space<vmem>>
      %142 = tpu.memref_slice %arg5[%c0_i32_36, %c3_i32_37] : memref<1x8x!tpu.dma_semaphore, #tpu.memory_space<semaphore_mem>> -> memref<1x1x!tpu.dma_semaphore, #tpu.memory_space<semaphore_mem>>
      %143 = tpu.memref_squeeze %142 : memref<1x1x!tpu.dma_semaphore, #tpu.memory_space<semaphore_mem>> -> memref<!tpu.dma_semaphore, #tpu.memory_space<semaphore_mem>>
      tpu.enqueue_dma source(%139 : memref<640xf32, #tpu.memory_space<any>>) target(%141 : memref<640xf32, #tpu.memory_space<vmem>>) target_semaphore(%143 : memref<!tpu.dma_semaphore, #tpu.memory_space<semaphore_mem>>)
    } else {
    }
    %c0_i32_39 = arith.constant 0 : i32
    %51 = arith.cmpi eq, %44, %c0_i32_39 : i32
    %52 = arith.extui %51 : i1 to i32
    %c0_i32_40 = arith.constant 0 : i32
    %53 = arith.cmpi ne, %52, %c0_i32_40 : i32
    scf.if %53 {
      %c0 = arith.constant 0 : index
      %c3 = arith.constant 3 : index
      %c0_137 = arith.constant 0 : index
      %138 = vector.load %arg3[%c0, %c3, %c0_137] : memref<1x8x640xf32, #tpu.memory_space<vmem>>, vector<1x1x640xf32>
      %139 = vector.shape_cast %138 : vector<1x1x640xf32> to vector<640xf32>
      %140 = vector.shape_cast %1 : vector<640xf32> to vector<1x1x640xf32>
      tpu.vector_store %arg3[%c0, %c3, %c0_137], %140 {strides = array<i32>} : memref<1x8x640xf32, #tpu.memory_space<vmem>>, vector<1x1x640xf32>,
    } else {
    }
    %c0_i32_41 = arith.constant 0 : i32
    %54 = arith.addi %0, %c0_i32_41 : i32
    %c4_i32 = arith.constant 4 : i32
    %55 = arith.addi %54, %c4_i32 : i32
    %56 = arith.index_cast %55 : i32 to index
    %57 = memref.load %arg1[%56] : memref<16xi32, #tpu.memory_space<smem>>
    %c0_i32_42 = arith.constant 0 : i32
    %58 = arith.cmpi eq, %57, %c0_i32_42 : i32
    %59 = arith.extui %58 : i1 to i32
    %60 = arith.addi %47, %59 : i32
    %c0_i32_43 = arith.constant 0 : i32
    %61 = arith.cmpi ne, %57, %c0_i32_43 : i32
    %62 = arith.extui %61 : i1 to i32
    %c0_i32_44 = arith.constant 0 : i32
    %c4_i32_45 = arith.constant 4 : i32
    %c0_i32_46 = arith.constant 0 : i32
    %c4_i32_47 = arith.constant 4 : i32
    %c0_i32_48 = arith.constant 0 : i32
    %63 = arith.cmpi ne, %62, %c0_i32_48 : i32
    scf.if %63 {
      %c0_i32_137 = arith.constant 0 : i32
      %138 = tpu.memref_slice %arg2[%57, %c0_i32_137] : memref<24x640xf32, #tpu.memory_space<any>> -> memref<1x640xf32, #tpu.memory_space<any>>
      %139 = tpu.memref_squeeze %138 : memref<1x640xf32, #tpu.memory_space<any>> -> memref<640xf32, #tpu.memory_space<any>>
      %c0_i32_138 = arith.constant 0 : i32
      %140 = tpu.memref_slice %arg3[%c0_i32_44, %c4_i32_45, %c0_i32_138] : memref<1x8x640xf32, #tpu.memory_space<vmem>> -> memref<1x1x640xf32, #tpu.memory_space<vmem>>
      %141 = tpu.memref_squeeze %140 : memref<1x1x640xf32, #tpu.memory_space<vmem>> -> memref<640xf32, #tpu.memory_space<vmem>>
      %142 = tpu.memref_slice %arg5[%c0_i32_46, %c4_i32_47] : memref<1x8x!tpu.dma_semaphore, #tpu.memory_space<semaphore_mem>> -> memref<1x1x!tpu.dma_semaphore, #tpu.memory_space<semaphore_mem>>
      %143 = tpu.memref_squeeze %142 : memref<1x1x!tpu.dma_semaphore, #tpu.memory_space<semaphore_mem>> -> memref<!tpu.dma_semaphore, #tpu.memory_space<semaphore_mem>>
      tpu.enqueue_dma source(%139 : memref<640xf32, #tpu.memory_space<any>>) target(%141 : memref<640xf32, #tpu.memory_space<vmem>>) target_semaphore(%143 : memref<!tpu.dma_semaphore, #tpu.memory_space<semaphore_mem>>)
    } else {
    }
    %c0_i32_49 = arith.constant 0 : i32
    %64 = arith.cmpi eq, %57, %c0_i32_49 : i32
    %65 = arith.extui %64 : i1 to i32
    %c0_i32_50 = arith.constant 0 : i32
    %66 = arith.cmpi ne, %65, %c0_i32_50 : i32
    scf.if %66 {
      %c0 = arith.constant 0 : index
      %c4 = arith.constant 4 : index
      %c0_137 = arith.constant 0 : index
      %138 = vector.load %arg3[%c0, %c4, %c0_137] : memref<1x8x640xf32, #tpu.memory_space<vmem>>, vector<1x1x640xf32>
      %139 = vector.shape_cast %138 : vector<1x1x640xf32> to vector<640xf32>
      %140 = vector.shape_cast %1 : vector<640xf32> to vector<1x1x640xf32>
      tpu.vector_store %arg3[%c0, %c4, %c0_137], %140 {strides = array<i32>} : memref<1x8x640xf32, #tpu.memory_space<vmem>>, vector<1x1x640xf32>,
    } else {
    }
    %c0_i32_51 = arith.constant 0 : i32
    %67 = arith.addi %0, %c0_i32_51 : i32
    %c5_i32 = arith.constant 5 : i32
    %68 = arith.addi %67, %c5_i32 : i32
    %69 = arith.index_cast %68 : i32 to index
    %70 = memref.load %arg1[%69] : memref<16xi32, #tpu.memory_space<smem>>
    %c0_i32_52 = arith.constant 0 : i32
    %71 = arith.cmpi eq, %70, %c0_i32_52 : i32
    %72 = arith.extui %71 : i1 to i32
    %73 = arith.addi %60, %72 : i32
    %c0_i32_53 = arith.constant 0 : i32
    %74 = arith.cmpi ne, %70, %c0_i32_53 : i32
    %75 = arith.extui %74 : i1 to i32
    %c0_i32_54 = arith.constant 0 : i32
    %c5_i32_55 = arith.constant 5 : i32
    %c0_i32_56 = arith.constant 0 : i32
    %c5_i32_57 = arith.constant 5 : i32
    %c0_i32_58 = arith.constant 0 : i32
    %76 = arith.cmpi ne, %75, %c0_i32_58 : i32
    scf.if %76 {
      %c0_i32_137 = arith.constant 0 : i32
      %138 = tpu.memref_slice %arg2[%70, %c0_i32_137] : memref<24x640xf32, #tpu.memory_space<any>> -> memref<1x640xf32, #tpu.memory_space<any>>
      %139 = tpu.memref_squeeze %138 : memref<1x640xf32, #tpu.memory_space<any>> -> memref<640xf32, #tpu.memory_space<any>>
      %c0_i32_138 = arith.constant 0 : i32
      %140 = tpu.memref_slice %arg3[%c0_i32_54, %c5_i32_55, %c0_i32_138] : memref<1x8x640xf32, #tpu.memory_space<vmem>> -> memref<1x1x640xf32, #tpu.memory_space<vmem>>
      %141 = tpu.memref_squeeze %140 : memref<1x1x640xf32, #tpu.memory_space<vmem>> -> memref<640xf32, #tpu.memory_space<vmem>>
      %142 = tpu.memref_slice %arg5[%c0_i32_56, %c5_i32_57] : memref<1x8x!tpu.dma_semaphore, #tpu.memory_space<semaphore_mem>> -> memref<1x1x!tpu.dma_semaphore, #tpu.memory_space<semaphore_mem>>
      %143 = tpu.memref_squeeze %142 : memref<1x1x!tpu.dma_semaphore, #tpu.memory_space<semaphore_mem>> -> memref<!tpu.dma_semaphore, #tpu.memory_space<semaphore_mem>>
      tpu.enqueue_dma source(%139 : memref<640xf32, #tpu.memory_space<any>>) target(%141 : memref<640xf32, #tpu.memory_space<vmem>>) target_semaphore(%143 : memref<!tpu.dma_semaphore, #tpu.memory_space<semaphore_mem>>)
    } else {
    }
    %c0_i32_59 = arith.constant 0 : i32
    %77 = arith.cmpi eq, %70, %c0_i32_59 : i32
    %78 = arith.extui %77 : i1 to i32
    %c0_i32_60 = arith.constant 0 : i32
    %79 = arith.cmpi ne, %78, %c0_i32_60 : i32
    scf.if %79 {
      %c0 = arith.constant 0 : index
      %c5 = arith.constant 5 : index
      %c0_137 = arith.constant 0 : index
      %138 = vector.load %arg3[%c0, %c5, %c0_137] : memref<1x8x640xf32, #tpu.memory_space<vmem>>, vector<1x1x640xf32>
      %139 = vector.shape_cast %138 : vector<1x1x640xf32> to vector<640xf32>
      %140 = vector.shape_cast %1 : vector<640xf32> to vector<1x1x640xf32>
      tpu.vector_store %arg3[%c0, %c5, %c0_137], %140 {strides = array<i32>} : memref<1x8x640xf32, #tpu.memory_space<vmem>>, vector<1x1x640xf32>,
    } else {
    }
    %c0_i32_61 = arith.constant 0 : i32
    %80 = arith.addi %0, %c0_i32_61 : i32
    %c6_i32 = arith.constant 6 : i32
    %81 = arith.addi %80, %c6_i32 : i32
    %82 = arith.index_cast %81 : i32 to index
    %83 = memref.load %arg1[%82] : memref<16xi32, #tpu.memory_space<smem>>
    %c0_i32_62 = arith.constant 0 : i32
    %84 = arith.cmpi eq, %83, %c0_i32_62 : i32
    %85 = arith.extui %84 : i1 to i32
    %86 = arith.addi %73, %85 : i32
    %c0_i32_63 = arith.constant 0 : i32
    %87 = arith.cmpi ne, %83, %c0_i32_63 : i32
    %88 = arith.extui %87 : i1 to i32
    %c0_i32_64 = arith.constant 0 : i32
    %c6_i32_65 = arith.constant 6 : i32
    %c0_i32_66 = arith.constant 0 : i32
    %c6_i32_67 = arith.constant 6 : i32
    %c0_i32_68 = arith.constant 0 : i32
    %89 = arith.cmpi ne, %88, %c0_i32_68 : i32
    scf.if %89 {
      %c0_i32_137 = arith.constant 0 : i32
      %138 = tpu.memref_slice %arg2[%83, %c0_i32_137] : memref<24x640xf32, #tpu.memory_space<any>> -> memref<1x640xf32, #tpu.memory_space<any>>
      %139 = tpu.memref_squeeze %138 : memref<1x640xf32, #tpu.memory_space<any>> -> memref<640xf32, #tpu.memory_space<any>>
      %c0_i32_138 = arith.constant 0 : i32
      %140 = tpu.memref_slice %arg3[%c0_i32_64, %c6_i32_65, %c0_i32_138] : memref<1x8x640xf32, #tpu.memory_space<vmem>> -> memref<1x1x640xf32, #tpu.memory_space<vmem>>
      %141 = tpu.memref_squeeze %140 : memref<1x1x640xf32, #tpu.memory_space<vmem>> -> memref<640xf32, #tpu.memory_space<vmem>>
      %142 = tpu.memref_slice %arg5[%c0_i32_66, %c6_i32_67] : memref<1x8x!tpu.dma_semaphore, #tpu.memory_space<semaphore_mem>> -> memref<1x1x!tpu.dma_semaphore, #tpu.memory_space<semaphore_mem>>
      %143 = tpu.memref_squeeze %142 : memref<1x1x!tpu.dma_semaphore, #tpu.memory_space<semaphore_mem>> -> memref<!tpu.dma_semaphore, #tpu.memory_space<semaphore_mem>>
      tpu.enqueue_dma source(%139 : memref<640xf32, #tpu.memory_space<any>>) target(%141 : memref<640xf32, #tpu.memory_space<vmem>>) target_semaphore(%143 : memref<!tpu.dma_semaphore, #tpu.memory_space<semaphore_mem>>)
    } else {
    }
    %c0_i32_69 = arith.constant 0 : i32
    %90 = arith.cmpi eq, %83, %c0_i32_69 : i32
    %91 = arith.extui %90 : i1 to i32
    %c0_i32_70 = arith.constant 0 : i32
    %92 = arith.cmpi ne, %91, %c0_i32_70 : i32
    scf.if %92 {
      %c0 = arith.constant 0 : index
      %c6 = arith.constant 6 : index
      %c0_137 = arith.constant 0 : index
      %138 = vector.load %arg3[%c0, %c6, %c0_137] : memref<1x8x640xf32, #tpu.memory_space<vmem>>, vector<1x1x640xf32>
      %139 = vector.shape_cast %138 : vector<1x1x640xf32> to vector<640xf32>
      %140 = vector.shape_cast %1 : vector<640xf32> to vector<1x1x640xf32>
      tpu.vector_store %arg3[%c0, %c6, %c0_137], %140 {strides = array<i32>} : memref<1x8x640xf32, #tpu.memory_space<vmem>>, vector<1x1x640xf32>,
    } else {
    }
    %c0_i32_71 = arith.constant 0 : i32
    %93 = arith.addi %0, %c0_i32_71 : i32
    %c7_i32 = arith.constant 7 : i32
    %94 = arith.addi %93, %c7_i32 : i32
    %95 = arith.index_cast %94 : i32 to index
    %96 = memref.load %arg1[%95] : memref<16xi32, #tpu.memory_space<smem>>
    %c0_i32_72 = arith.constant 0 : i32
    %97 = arith.cmpi eq, %96, %c0_i32_72 : i32
    %98 = arith.extui %97 : i1 to i32
    %99 = arith.addi %86, %98 : i32
    %c0_i32_73 = arith.constant 0 : i32
    %100 = arith.cmpi ne, %96, %c0_i32_73 : i32
    %101 = arith.extui %100 : i1 to i32
    %c0_i32_74 = arith.constant 0 : i32
    %c7_i32_75 = arith.constant 7 : i32
    %c0_i32_76 = arith.constant 0 : i32
    %c7_i32_77 = arith.constant 7 : i32
    %c0_i32_78 = arith.constant 0 : i32
    %102 = arith.cmpi ne, %101, %c0_i32_78 : i32
    scf.if %102 {
      %c0_i32_137 = arith.constant 0 : i32
      %138 = tpu.memref_slice %arg2[%96, %c0_i32_137] : memref<24x640xf32, #tpu.memory_space<any>> -> memref<1x640xf32, #tpu.memory_space<any>>
      %139 = tpu.memref_squeeze %138 : memref<1x640xf32, #tpu.memory_space<any>> -> memref<640xf32, #tpu.memory_space<any>>
      %c0_i32_138 = arith.constant 0 : i32
      %140 = tpu.memref_slice %arg3[%c0_i32_74, %c7_i32_75, %c0_i32_138] : memref<1x8x640xf32, #tpu.memory_space<vmem>> -> memref<1x1x640xf32, #tpu.memory_space<vmem>>
      %141 = tpu.memref_squeeze %140 : memref<1x1x640xf32, #tpu.memory_space<vmem>> -> memref<640xf32, #tpu.memory_space<vmem>>
      %142 = tpu.memref_slice %arg5[%c0_i32_76, %c7_i32_77] : memref<1x8x!tpu.dma_semaphore, #tpu.memory_space<semaphore_mem>> -> memref<1x1x!tpu.dma_semaphore, #tpu.memory_space<semaphore_mem>>
      %143 = tpu.memref_squeeze %142 : memref<1x1x!tpu.dma_semaphore, #tpu.memory_space<semaphore_mem>> -> memref<!tpu.dma_semaphore, #tpu.memory_space<semaphore_mem>>
      tpu.enqueue_dma source(%139 : memref<640xf32, #tpu.memory_space<any>>) target(%141 : memref<640xf32, #tpu.memory_space<vmem>>) target_semaphore(%143 : memref<!tpu.dma_semaphore, #tpu.memory_space<semaphore_mem>>)
    } else {
    }
    %c0_i32_79 = arith.constant 0 : i32
    %103 = arith.cmpi eq, %96, %c0_i32_79 : i32
    %104 = arith.extui %103 : i1 to i32
    %c0_i32_80 = arith.constant 0 : i32
    %105 = arith.cmpi ne, %104, %c0_i32_80 : i32
    scf.if %105 {
      %c0 = arith.constant 0 : index
      %c7 = arith.constant 7 : index
      %c0_137 = arith.constant 0 : index
      %138 = vector.load %arg3[%c0, %c7, %c0_137] : memref<1x8x640xf32, #tpu.memory_space<vmem>>, vector<1x1x640xf32>
      %139 = vector.shape_cast %138 : vector<1x1x640xf32> to vector<640xf32>
      %140 = vector.shape_cast %1 : vector<640xf32> to vector<1x1x640xf32>
      tpu.vector_store %arg3[%c0, %c7, %c0_137], %140 {strides = array<i32>} : memref<1x8x640xf32, #tpu.memory_space<vmem>>, vector<1x1x640xf32>,
    } else {
    }
    %c8_i32_81 = arith.constant 8 : i32
    %106 = arith.subi %c8_i32_81, %99 : i32
    %c0_i32_82 = arith.constant 0 : i32
    %107 = arith.cmpi sgt, %106, %c0_i32_82 : i32
    %c1_i32_83 = arith.constant 1 : i32
    %108 = arith.subi %106, %c1_i32_83 : i32
    %c7_i32_84 = arith.constant 7 : i32
    %109 = arith.select %107, %108, %c7_i32_84 : i32
    %c0_i32_85 = arith.constant 0 : i32
    %110 = arith.addi %0, %c0_i32_85 : i32
    %111 = arith.addi %110, %109 : i32
    %112 = arith.index_cast %111 : i32 to index
    %113 = memref.load %arg1[%112] : memref<16xi32, #tpu.memory_space<smem>>
    %c0_i32_86 = arith.constant 0 : i32
    %114 = arith.cmpi ne, %113, %c0_i32_86 : i32
    %115 = arith.extui %114 : i1 to i32
    %c0_i32_87 = arith.constant 0 : i32
    %c0_i32_88 = arith.constant 0 : i32
    %c0_i32_89 = arith.constant 0 : i32
    %c0_i32_90 = arith.constant 0 : i32
    %116 = arith.cmpi ne, %115, %c0_i32_90 : i32
    scf.if %116 {
      %c0_i32_137 = arith.constant 0 : i32
      %138 = tpu.memref_slice %arg2[%113, %c0_i32_137] : memref<24x640xf32, #tpu.memory_space<any>> -> memref<1x640xf32, #tpu.memory_space<any>>
      %139 = tpu.memref_squeeze %138 : memref<1x640xf32, #tpu.memory_space<any>> -> memref<640xf32, #tpu.memory_space<any>>
      %c0_i32_138 = arith.constant 0 : i32
      %140 = tpu.memref_slice %arg4[%c0_i32_87, %c0_i32_88, %c0_i32_138] : memref<1x1x640xf32, #tpu.memory_space<vmem>> -> memref<1x1x640xf32, #tpu.memory_space<vmem>>
      %141 = tpu.memref_squeeze %140 : memref<1x1x640xf32, #tpu.memory_space<vmem>> -> memref<640xf32, #tpu.memory_space<vmem>>
      %142 = tpu.memref_slice %arg6[%c0_i32_89] : memref<1x!tpu.dma_semaphore, #tpu.memory_space<semaphore_mem>> -> memref<1x!tpu.dma_semaphore, #tpu.memory_space<semaphore_mem>>
      %143 = tpu.memref_squeeze %142 : memref<1x!tpu.dma_semaphore, #tpu.memory_space<semaphore_mem>> -> memref<!tpu.dma_semaphore, #tpu.memory_space<semaphore_mem>>
      tpu.enqueue_dma source(%139 : memref<640xf32, #tpu.memory_space<any>>) target(%141 : memref<640xf32, #tpu.memory_space<vmem>>) target_semaphore(%143 : memref<!tpu.dma_semaphore, #tpu.memory_space<semaphore_mem>>)
    } else {
    }
    %c0_i32_91 = arith.constant 0 : i32
    %117 = arith.cmpi eq, %113, %c0_i32_91 : i32
    %118 = arith.extui %117 : i1 to i32
    %c0_i32_92 = arith.constant 0 : i32
    %119 = arith.cmpi ne, %118, %c0_i32_92 : i32
    scf.if %119 {
      %c0 = arith.constant 0 : index
      %c0_137 = arith.constant 0 : index
      %c0_138 = arith.constant 0 : index
      %138 = vector.load %arg4[%c0, %c0_137, %c0_138] : memref<1x1x640xf32, #tpu.memory_space<vmem>>, vector<1x1x640xf32>
      %139 = vector.shape_cast %138 : vector<1x1x640xf32> to vector<640xf32>
      %140 = vector.shape_cast %1 : vector<640xf32> to vector<1x1x640xf32>
      tpu.vector_store %arg4[%c0, %c0_137, %c0_138], %140 {strides = array<i32>} : memref<1x1x640xf32, #tpu.memory_space<vmem>>, vector<1x1x640xf32>,
    } else {
    }
    %120 = arith.extui %9 : i1 to i32
    %c0_i32_93 = arith.constant 0 : i32
    %c0_i32_94 = arith.constant 0 : i32
    %c0_i32_95 = arith.constant 0 : i32
    %c0_i32_96 = arith.constant 0 : i32
    %c0_i32_97 = arith.constant 0 : i32
    %121 = arith.cmpi ne, %120, %c0_i32_97 : i32
    scf.if %121 {
      %c0_i32_137 = arith.constant 0 : i32
      %138 = tpu.memref_slice %arg2[%5, %c0_i32_137] : memref<24x640xf32, #tpu.memory_space<any>> -> memref<1x640xf32, #tpu.memory_space<any>>
      %139 = tpu.memref_squeeze %138 : memref<1x640xf32, #tpu.memory_space<any>> -> memref<640xf32, #tpu.memory_space<any>>
      %c0_i32_138 = arith.constant 0 : i32
      %140 = tpu.memref_slice %arg3[%c0_i32_93, %c0_i32_94, %c0_i32_138] : memref<1x8x640xf32, #tpu.memory_space<vmem>> -> memref<1x1x640xf32, #tpu.memory_space<vmem>>
      %141 = tpu.memref_squeeze %140 : memref<1x1x640xf32, #tpu.memory_space<vmem>> -> memref<640xf32, #tpu.memory_space<vmem>>
      %142 = tpu.memref_slice %arg5[%c0_i32_95, %c0_i32_96] : memref<1x8x!tpu.dma_semaphore, #tpu.memory_space<semaphore_mem>> -> memref<1x1x!tpu.dma_semaphore, #tpu.memory_space<semaphore_mem>>
      %143 = tpu.memref_squeeze %142 : memref<1x1x!tpu.dma_semaphore, #tpu.memory_space<semaphore_mem>> -> memref<!tpu.dma_semaphore, #tpu.memory_space<semaphore_mem>>
      tpu.wait_dma2 semaphore(%143 : memref<!tpu.dma_semaphore, #tpu.memory_space<semaphore_mem>>) src(%139 : memref<640xf32, #tpu.memory_space<any>>) dst(%141 : memref<640xf32, #tpu.memory_space<vmem>>)
    } else {
    }
    %122 = arith.extui %22 : i1 to i32
    %c0_i32_98 = arith.constant 0 : i32
    %c1_i32_99 = arith.constant 1 : i32
    %c0_i32_100 = arith.constant 0 : i32
    %c1_i32_101 = arith.constant 1 : i32
    %c0_i32_102 = arith.constant 0 : i32
    %123 = arith.cmpi ne, %122, %c0_i32_102 : i32
    scf.if %123 {
      %c0_i32_137 = arith.constant 0 : i32
      %138 = tpu.memref_slice %arg2[%18, %c0_i32_137] : memref<24x640xf32, #tpu.memory_space<any>> -> memref<1x640xf32, #tpu.memory_space<any>>
      %139 = tpu.memref_squeeze %138 : memref<1x640xf32, #tpu.memory_space<any>> -> memref<640xf32, #tpu.memory_space<any>>
      %c0_i32_138 = arith.constant 0 : i32
      %140 = tpu.memref_slice %arg3[%c0_i32_98, %c1_i32_99, %c0_i32_138] : memref<1x8x640xf32, #tpu.memory_space<vmem>> -> memref<1x1x640xf32, #tpu.memory_space<vmem>>
      %141 = tpu.memref_squeeze %140 : memref<1x1x640xf32, #tpu.memory_space<vmem>> -> memref<640xf32, #tpu.memory_space<vmem>>
      %142 = tpu.memref_slice %arg5[%c0_i32_100, %c1_i32_101] : memref<1x8x!tpu.dma_semaphore, #tpu.memory_space<semaphore_mem>> -> memref<1x1x!tpu.dma_semaphore, #tpu.memory_space<semaphore_mem>>
      %143 = tpu.memref_squeeze %142 : memref<1x1x!tpu.dma_semaphore, #tpu.memory_space<semaphore_mem>> -> memref<!tpu.dma_semaphore, #tpu.memory_space<semaphore_mem>>
      tpu.wait_dma2 semaphore(%143 : memref<!tpu.dma_semaphore, #tpu.memory_space<semaphore_mem>>) src(%139 : memref<640xf32, #tpu.memory_space<any>>) dst(%141 : memref<640xf32, #tpu.memory_space<vmem>>)
    } else {
    }
    %124 = arith.extui %35 : i1 to i32
    %c0_i32_103 = arith.constant 0 : i32
    %c2_i32_104 = arith.constant 2 : i32
    %c0_i32_105 = arith.constant 0 : i32
    %c2_i32_106 = arith.constant 2 : i32
    %c0_i32_107 = arith.constant 0 : i32
    %125 = arith.cmpi ne, %124, %c0_i32_107 : i32
    scf.if %125 {
      %c0_i32_137 = arith.constant 0 : i32
      %138 = tpu.memref_slice %arg2[%31, %c0_i32_137] : memref<24x640xf32, #tpu.memory_space<any>> -> memref<1x640xf32, #tpu.memory_space<any>>
      %139 = tpu.memref_squeeze %138 : memref<1x640xf32, #tpu.memory_space<any>> -> memref<640xf32, #tpu.memory_space<any>>
      %c0_i32_138 = arith.constant 0 : i32
      %140 = tpu.memref_slice %arg3[%c0_i32_103, %c2_i32_104, %c0_i32_138] : memref<1x8x640xf32, #tpu.memory_space<vmem>> -> memref<1x1x640xf32, #tpu.memory_space<vmem>>
      %141 = tpu.memref_squeeze %140 : memref<1x1x640xf32, #tpu.memory_space<vmem>> -> memref<640xf32, #tpu.memory_space<vmem>>
      %142 = tpu.memref_slice %arg5[%c0_i32_105, %c2_i32_106] : memref<1x8x!tpu.dma_semaphore, #tpu.memory_space<semaphore_mem>> -> memref<1x1x!tpu.dma_semaphore, #tpu.memory_space<semaphore_mem>>
      %143 = tpu.memref_squeeze %142 : memref<1x1x!tpu.dma_semaphore, #tpu.memory_space<semaphore_mem>> -> memref<!tpu.dma_semaphore, #tpu.memory_space<semaphore_mem>>
      tpu.wait_dma2 semaphore(%143 : memref<!tpu.dma_semaphore, #tpu.memory_space<semaphore_mem>>) src(%139 : memref<640xf32, #tpu.memory_space<any>>) dst(%141 : memref<640xf32, #tpu.memory_space<vmem>>)
    } else {
    }
    %126 = arith.extui %48 : i1 to i32
    %c0_i32_108 = arith.constant 0 : i32
    %c3_i32_109 = arith.constant 3 : i32
    %c0_i32_110 = arith.constant 0 : i32
    %c3_i32_111 = arith.constant 3 : i32
    %c0_i32_112 = arith.constant 0 : i32
    %127 = arith.cmpi ne, %126, %c0_i32_112 : i32
    scf.if %127 {
      %c0_i32_137 = arith.constant 0 : i32
      %138 = tpu.memref_slice %arg2[%44, %c0_i32_137] : memref<24x640xf32, #tpu.memory_space<any>> -> memref<1x640xf32, #tpu.memory_space<any>>
      %139 = tpu.memref_squeeze %138 : memref<1x640xf32, #tpu.memory_space<any>> -> memref<640xf32, #tpu.memory_space<any>>
      %c0_i32_138 = arith.constant 0 : i32
      %140 = tpu.memref_slice %arg3[%c0_i32_108, %c3_i32_109, %c0_i32_138] : memref<1x8x640xf32, #tpu.memory_space<vmem>> -> memref<1x1x640xf32, #tpu.memory_space<vmem>>
      %141 = tpu.memref_squeeze %140 : memref<1x1x640xf32, #tpu.memory_space<vmem>> -> memref<640xf32, #tpu.memory_space<vmem>>
      %142 = tpu.memref_slice %arg5[%c0_i32_110, %c3_i32_111] : memref<1x8x!tpu.dma_semaphore, #tpu.memory_space<semaphore_mem>> -> memref<1x1x!tpu.dma_semaphore, #tpu.memory_space<semaphore_mem>>
      %143 = tpu.memref_squeeze %142 : memref<1x1x!tpu.dma_semaphore, #tpu.memory_space<semaphore_mem>> -> memref<!tpu.dma_semaphore, #tpu.memory_space<semaphore_mem>>
      tpu.wait_dma2 semaphore(%143 : memref<!tpu.dma_semaphore, #tpu.memory_space<semaphore_mem>>) src(%139 : memref<640xf32, #tpu.memory_space<any>>) dst(%141 : memref<640xf32, #tpu.memory_space<vmem>>)
    } else {
    }
    %128 = arith.extui %61 : i1 to i32
    %c0_i32_113 = arith.constant 0 : i32
    %c4_i32_114 = arith.constant 4 : i32
    %c0_i32_115 = arith.constant 0 : i32
    %c4_i32_116 = arith.constant 4 : i32
    %c0_i32_117 = arith.constant 0 : i32
    %129 = arith.cmpi ne, %128, %c0_i32_117 : i32
    scf.if %129 {
      %c0_i32_137 = arith.constant 0 : i32
      %138 = tpu.memref_slice %arg2[%57, %c0_i32_137] : memref<24x640xf32, #tpu.memory_space<any>> -> memref<1x640xf32, #tpu.memory_space<any>>
      %139 = tpu.memref_squeeze %138 : memref<1x640xf32, #tpu.memory_space<any>> -> memref<640xf32, #tpu.memory_space<any>>
      %c0_i32_138 = arith.constant 0 : i32
      %140 = tpu.memref_slice %arg3[%c0_i32_113, %c4_i32_114, %c0_i32_138] : memref<1x8x640xf32, #tpu.memory_space<vmem>> -> memref<1x1x640xf32, #tpu.memory_space<vmem>>
      %141 = tpu.memref_squeeze %140 : memref<1x1x640xf32, #tpu.memory_space<vmem>> -> memref<640xf32, #tpu.memory_space<vmem>>
      %142 = tpu.memref_slice %arg5[%c0_i32_115, %c4_i32_116] : memref<1x8x!tpu.dma_semaphore, #tpu.memory_space<semaphore_mem>> -> memref<1x1x!tpu.dma_semaphore, #tpu.memory_space<semaphore_mem>>
      %143 = tpu.memref_squeeze %142 : memref<1x1x!tpu.dma_semaphore, #tpu.memory_space<semaphore_mem>> -> memref<!tpu.dma_semaphore, #tpu.memory_space<semaphore_mem>>
      tpu.wait_dma2 semaphore(%143 : memref<!tpu.dma_semaphore, #tpu.memory_space<semaphore_mem>>) src(%139 : memref<640xf32, #tpu.memory_space<any>>) dst(%141 : memref<640xf32, #tpu.memory_space<vmem>>)
    } else {
    }
    %130 = arith.extui %74 : i1 to i32
    %c0_i32_118 = arith.constant 0 : i32
    %c5_i32_119 = arith.constant 5 : i32
    %c0_i32_120 = arith.constant 0 : i32
    %c5_i32_121 = arith.constant 5 : i32
    %c0_i32_122 = arith.constant 0 : i32
    %131 = arith.cmpi ne, %130, %c0_i32_122 : i32
    scf.if %131 {
      %c0_i32_137 = arith.constant 0 : i32
      %138 = tpu.memref_slice %arg2[%70, %c0_i32_137] : memref<24x640xf32, #tpu.memory_space<any>> -> memref<1x640xf32, #tpu.memory_space<any>>
      %139 = tpu.memref_squeeze %138 : memref<1x640xf32, #tpu.memory_space<any>> -> memref<640xf32, #tpu.memory_space<any>>
      %c0_i32_138 = arith.constant 0 : i32
      %140 = tpu.memref_slice %arg3[%c0_i32_118, %c5_i32_119, %c0_i32_138] : memref<1x8x640xf32, #tpu.memory_space<vmem>> -> memref<1x1x640xf32, #tpu.memory_space<vmem>>
      %141 = tpu.memref_squeeze %140 : memref<1x1x640xf32, #tpu.memory_space<vmem>> -> memref<640xf32, #tpu.memory_space<vmem>>
      %142 = tpu.memref_slice %arg5[%c0_i32_120, %c5_i32_121] : memref<1x8x!tpu.dma_semaphore, #tpu.memory_space<semaphore_mem>> -> memref<1x1x!tpu.dma_semaphore, #tpu.memory_space<semaphore_mem>>
      %143 = tpu.memref_squeeze %142 : memref<1x1x!tpu.dma_semaphore, #tpu.memory_space<semaphore_mem>> -> memref<!tpu.dma_semaphore, #tpu.memory_space<semaphore_mem>>
      tpu.wait_dma2 semaphore(%143 : memref<!tpu.dma_semaphore, #tpu.memory_space<semaphore_mem>>) src(%139 : memref<640xf32, #tpu.memory_space<any>>) dst(%141 : memref<640xf32, #tpu.memory_space<vmem>>)
    } else {
    }
    %132 = arith.extui %87 : i1 to i32
    %c0_i32_123 = arith.constant 0 : i32
    %c6_i32_124 = arith.constant 6 : i32
    %c0_i32_125 = arith.constant 0 : i32
    %c6_i32_126 = arith.constant 6 : i32
    %c0_i32_127 = arith.constant 0 : i32
    %133 = arith.cmpi ne, %132, %c0_i32_127 : i32
    scf.if %133 {
      %c0_i32_137 = arith.constant 0 : i32
      %138 = tpu.memref_slice %arg2[%83, %c0_i32_137] : memref<24x640xf32, #tpu.memory_space<any>> -> memref<1x640xf32, #tpu.memory_space<any>>
      %139 = tpu.memref_squeeze %138 : memref<1x640xf32, #tpu.memory_space<any>> -> memref<640xf32, #tpu.memory_space<any>>
      %c0_i32_138 = arith.constant 0 : i32
      %140 = tpu.memref_slice %arg3[%c0_i32_123, %c6_i32_124, %c0_i32_138] : memref<1x8x640xf32, #tpu.memory_space<vmem>> -> memref<1x1x640xf32, #tpu.memory_space<vmem>>
      %141 = tpu.memref_squeeze %140 : memref<1x1x640xf32, #tpu.memory_space<vmem>> -> memref<640xf32, #tpu.memory_space<vmem>>
      %142 = tpu.memref_slice %arg5[%c0_i32_125, %c6_i32_126] : memref<1x8x!tpu.dma_semaphore, #tpu.memory_space<semaphore_mem>> -> memref<1x1x!tpu.dma_semaphore, #tpu.memory_space<semaphore_mem>>
      %143 = tpu.memref_squeeze %142 : memref<1x1x!tpu.dma_semaphore, #tpu.memory_space<semaphore_mem>> -> memref<!tpu.dma_semaphore, #tpu.memory_space<semaphore_mem>>
      tpu.wait_dma2 semaphore(%143 : memref<!tpu.dma_semaphore, #tpu.memory_space<semaphore_mem>>) src(%139 : memref<640xf32, #tpu.memory_space<any>>) dst(%141 : memref<640xf32, #tpu.memory_space<vmem>>)
    } else {
    }
    %134 = arith.extui %100 : i1 to i32
    %c0_i32_128 = arith.constant 0 : i32
    %c7_i32_129 = arith.constant 7 : i32
    %c0_i32_130 = arith.constant 0 : i32
    %c7_i32_131 = arith.constant 7 : i32
    %c0_i32_132 = arith.constant 0 : i32
    %135 = arith.cmpi ne, %134, %c0_i32_132 : i32
    scf.if %135 {
      %c0_i32_137 = arith.constant 0 : i32
      %138 = tpu.memref_slice %arg2[%96, %c0_i32_137] : memref<24x640xf32, #tpu.memory_space<any>> -> memref<1x640xf32, #tpu.memory_space<any>>
      %139 = tpu.memref_squeeze %138 : memref<1x640xf32, #tpu.memory_space<any>> -> memref<640xf32, #tpu.memory_space<any>>
      %c0_i32_138 = arith.constant 0 : i32
      %140 = tpu.memref_slice %arg3[%c0_i32_128, %c7_i32_129, %c0_i32_138] : memref<1x8x640xf32, #tpu.memory_space<vmem>> -> memref<1x1x640xf32, #tpu.memory_space<vmem>>
      %141 = tpu.memref_squeeze %140 : memref<1x1x640xf32, #tpu.memory_space<vmem>> -> memref<640xf32, #tpu.memory_space<vmem>>
      %142 = tpu.memref_slice %arg5[%c0_i32_130, %c7_i32_131] : memref<1x8x!tpu.dma_semaphore, #tpu.memory_space<semaphore_mem>> -> memref<1x1x!tpu.dma_semaphore, #tpu.memory_space<semaphore_mem>>
      %143 = tpu.memref_squeeze %142 : memref<1x1x!tpu.dma_semaphore, #tpu.memory_space<semaphore_mem>> -> memref<!tpu.dma_semaphore, #tpu.memory_space<semaphore_mem>>
      tpu.wait_dma2 semaphore(%143 : memref<!tpu.dma_semaphore, #tpu.memory_space<semaphore_mem>>) src(%139 : memref<640xf32, #tpu.memory_space<any>>) dst(%141 : memref<640xf32, #tpu.memory_space<vmem>>)
    } else {
    }
    %136 = arith.extui %114 : i1 to i32
    %c0_i32_133 = arith.constant 0 : i32
    %c0_i32_134 = arith.constant 0 : i32
    %c0_i32_135 = arith.constant 0 : i32
    %c0_i32_136 = arith.constant 0 : i32
    %137 = arith.cmpi ne, %136, %c0_i32_136 : i32
    scf.if %137 {
      %c0_i32_137 = arith.constant 0 : i32
      %138 = tpu.memref_slice %arg2[%113, %c0_i32_137] : memref<24x640xf32, #tpu.memory_space<any>> -> memref<1x640xf32, #tpu.memory_space<any>>
      %139 = tpu.memref_squeeze %138 : memref<1x640xf32, #tpu.memory_space<any>> -> memref<640xf32, #tpu.memory_space<any>>
      %c0_i32_138 = arith.constant 0 : i32
      %140 = tpu.memref_slice %arg4[%c0_i32_133, %c0_i32_134, %c0_i32_138] : memref<1x1x640xf32, #tpu.memory_space<vmem>> -> memref<1x1x640xf32, #tpu.memory_space<vmem>>
      %141 = tpu.memref_squeeze %140 : memref<1x1x640xf32, #tpu.memory_space<vmem>> -> memref<640xf32, #tpu.memory_space<vmem>>
      %142 = tpu.memref_slice %arg6[%c0_i32_135] : memref<1x!tpu.dma_semaphore, #tpu.memory_space<semaphore_mem>> -> memref<1x!tpu.dma_semaphore, #tpu.memory_space<semaphore_mem>>
      %143 = tpu.memref_squeeze %142 : memref<1x!tpu.dma_semaphore, #tpu.memory_space<semaphore_mem>> -> memref<!tpu.dma_semaphore, #tpu.memory_space<semaphore_mem>>
      tpu.wait_dma2 semaphore(%143 : memref<!tpu.dma_semaphore, #tpu.memory_space<semaphore_mem>>) src(%139 : memref<640xf32, #tpu.memory_space<any>>) dst(%141 : memref<640xf32, #tpu.memory_space<vmem>>)
    } else {
    }
    return
  }
  func.func @transform_1(%arg0: i32, %arg1: memref<16xi32, #tpu.memory_space<smem>>) -> (i32, i32, i32) {
    %c0_i32 = arith.constant 0 : i32
    %c0_i32_0 = arith.constant 0 : i32
    %c0_i32_1 = arith.constant 0 : i32
    return %arg0, %c0_i32, %c0_i32_0 : i32, i32, i32
  }
  func.func @transform_2(%arg0: i32, %arg1: memref<16xi32, #tpu.memory_space<smem>>) -> (i32, i32, i32) {
    %c0_i32 = arith.constant 0 : i32
    %c0_i32_0 = arith.constant 0 : i32
    %c0_i32_1 = arith.constant 0 : i32
    return %arg0, %c0_i32, %c0_i32_0 : i32, i32, i32
  }
}

</mosaic_0001>

<bundles_post_ra>
// kernel: tpu_custom_call.1
= control target key start
LH: loop header
LB: loop body
LE: loop exit
PB: predicated region body
PF: predicated region fallthrough
CT: control target
= control target key end

     0   :  { %s1191_s15 = smov [#allocation5]   ;;  %s1636_s0 = inlined_call_operand.hbm [shape: s32[16], index: 0, kind: input, shape index: {}]   ;;  %s1637_s1 = inlined_call_operand.hbm [shape: f32[24,640], index: 1, kind: input, shape index: {}]   ;;  %s1638_s2 = inlined_call_operand.hbm [shape: f32[2,8,640], index: 2, kind: output, shape index: {0}]   ;;  %s1639_s3 = inlined_call_operand.hbm [shape: f32[2,1,640], index: 3, kind: output, shape index: {1}]  }
   0x1   :  { %1656 = sst [smem:[#allocation38_spill]] %s1638_s2  ;;  %s10_s14 = sshll.u32 %s1636_s0, 4  ;;  %s11_s14 = int_to_ptr.hbm [resolvable:$true] %s10_s14 }
   0x2   :  { %1657 = sst [smem:[#allocation39_spill]] %s1639_s3 }
   0x3   :  { %13 = dma.hbm_to_smem %s11_s14, 16, %s1191_s15, [#allocation4] }
   0x4   :  { %1133 = dma.done.wait [#allocation4], 16 }
   0x5   :  { %1134 = vsyncadd [#allocation4], 4294967280 }
   0x6   :  { %16 = sfence }
   0x7   :  { %17 = vsyncpa [#allocation7], 0 }
   0x8   :  { %19 = vsyncpa [#allocation7 + $0x1], 0 }
   0x9   :  { %20 = vsyncpa [#allocation9], 0 }
   0xa   :  { %22 = vsyncpa [#allocation9 + $0x1], 0  ;;  %s1227_s16 = smov 0   ;;  %s1229_s17 = smov 0  }
   0xb   :  { %s1231_s18 = smov 0  }
   0xc LB: > { %1658 = sst [smem:[#allocation31_spill]] %s1181_s16  ;;  %s636_s0 = sadd.s32 4294967295, %s1189_s18   ;;  %s1189_s18 = sphi %s1231_s18, %s1697_s18   ;;  %s1185_s17 = sphi %s1229_s17, %s1699_s17   ;;  %s1181_s16 = sphi %s1227_s16, %s1698_s16  }
   0xd   : > { %1659 = sst [smem:[#allocation32_spill]] %s1185_s17  ;;  %s1244_s19 = sadd.s32 1, %s1189_s18  }
   0xe   : > { %1660 = sst [smem:[#allocation33_spill]] %s1244_s19  ;;  %s31_s20 = ssub.s32 %s1189_s18, %s1244_s19 }
   0xf   : > { %s34_s21 = sadd.s32 1, %s1185_s17  ;;  %p32_p0 = scmp.eq.s32.totalorder %s31_s20, 0 }
  0x10   : > { %p637_p1 = scmp.ne.s32.totalorder %s31_s20, 0  ;;  %p38_p2 = scmp.eq.s32.totalorder %s1189_s18, 1 }
  0x11   : > { %p43_p3 = scmp.ne.s32.totalorder %s1185_s17, %s1181_s16  ;;  %p44_p5 = scmp.eq.s32.totalorder %s636_s0, 1 }
  0x12   : > { %s1253_s22 = scalar_select %p32_p0, %s1185_s17, %s34_s21  }
  0x13   : > { %p1255_p4 = por %p637_p1, %p38_p2  ;;  %p1259_p6 = por %p44_p5, %p43_p3 }
  0x14   : > { %1661 = sst [smem:[#allocation34_spill]] %s1253_s22  ;;  %p639_p7 = scmp.ge.s32.totalorder %s1189_s18, 2 }
  0x15   : > { %s1662_s23 = scalar_select %p1255_p4, 1, 0 }
  0x16   : > { %s1664_s24 = scalar_select %p1259_p6, 1, 0 }
  0x17   : > { %1663 = sst [smem:[#allocation35_spill]] %s1662_s23  ;;  %72 = sbr.rel (%p639_p7) target bundleno = 408 (0x198), region = 12 }
  0x18   : > { %1665 = sst [smem:[#allocation36_spill]] %s1664_s24 }
  0x1c   : > { %s1265_s25 = sand.u32 1, %s1185_s17   ;;  %s1268_s26 = sshll.u32 %s1189_s18, 3 }
  0x1d   : > { %s1271_s27 = sld [smem:[#allocation5 + %s1268_s26]]  ;;  %s695_s28 = smul.u32 5, %s1265_s25 }
  0x1e   : > { %s694_s29 = smul.u32 40, %s1265_s25  ;;  %s1294_s21 = scalar_lea.hbm %s1637_s1, 120 }
  0x20   : > { %s1280_s7 = scalar_lea.vmem [#allocation6], %s694_s29 }
  0x21   : > { %s102_s8 = sshll.u32 %s1280_s7, 4  ;;  %s1287_s8 = int_to_ptr.vmem [resolvable:$true] %s102_s8 }
  0x22   : > { %1666 = sst [smem:[#allocation37_spill]] %s1287_s8 }
  0x23   : > { %p89_p8 = scmp.eq.s32.totalorder %s1271_s27, 0  ;;  %s95_s30 = sshrl.u32 %s1271_s27, 3 }
  0x24   : > { %s96_s4 = sand.u32 7, %s1271_s27   ;;  %s97_s6 = smul.u32 40, %s95_s30 }
  0x25   : > { %s1278_s5 = scalar_select %p89_p8, 1, 0 }
  0x26   : > { %p745_p9 = scmp.ne.s32.totalorder %s1271_s27, 0  ;;  %s98_s9 = sadd.s32 %s97_s6, %s96_s4 }
  0x27   : > { %s99_s12 = scalar_lea.hbm %s1637_s1, %s98_s9 }
  0x28   : > { %s100_s13 = sshll.u32 %s99_s12, 4  ;;  %s101_s13 = int_to_ptr.hbm [resolvable:$true] %s100_s13 }
  0x29   : > { %s813_s14 = sshra.s32 %s101_s13, 4  ;;  %s814_s14 = int_to_ptr.hbm [resolvable:$true] %s813_s14 }
  0x2a   : > { %s815_s15 = scalar_lea.hbm %s814_s14, 5  ;;  %p820_p13 = scmp.lt.s32.totalorder %s814_s14, %s1637_s1 }
  0x2b   : > { %p816_p10 = scmp.ne.s32.totalorder %s814_s14, %s815_s15  ;;  %p821_p0 = scmp.lt.s32.totalorder %s1294_s21, %s815_s15 }
  0x2d   : > { %p817_p11 = pnand %p816_p10, %p745_p9  ;;  %p822_p1 = por %p821_p0, %p820_p13 }
  0x2f   : > { %p818_p12 = pneg %p817_p11 }
  0x31   : > { %p823_p2 = pnand %p822_p1, %p818_p12 }
  0x33   : > { %826 = shalt.err (!%p823_p2)  }
  0x34   : > { %s1640_s4 = smov 128   ;;  %s1641_s6 = smov 1  }
  0x35   : > { %699 = dma.hbm_to_vmem [thread:$0]  (%p745_p9), %s101_s13, 80, %s1287_s8, [#allocation2], %s1640_s4, %s1640_s4, %s1641_s6 }
  0x36   : > { %s1308_s9 = scalar_lea.vmem [#allocation8], %s695_s28  ;;  %110 = sbr.rel (%p745_p9) target bundleno = 64 (0x40), region = 20 }
  0x3b   : > { %v111_v0 = vlaneseq  ;;  %v1194_v1 = vmov 0.0  }
  0x3d   : > { %vm113_vm0 = vcmp.lt.s32.totalorder %v111_v0, 640 }
  0x3e   : > { %115 = vst.msk [vmem:[%s1280_s7] ss:$8 sm:$0xf] %vm113_vm0, %v1194_v1 }
  0x3f   : > { %116 = vst.msk [vmem:[%s1280_s7] ss:$8 sm:$0x10] %vm113_vm0, %v1194_v1 }
  0x40 PF: > { %s117_s10 = sadd.s32 1, %s1268_s26  ;;  %s131_s28 = scalar_lea.vmem %s1280_s7, 1 [#allocation6] }
  0x41   : > { %s1315_s11 = sld [smem:[#allocation5 + %s117_s10]]  ;;  %s135_s0 = sshll.u32 %s131_s28, 4  ;;  %s136_s0 = int_to_ptr.vmem [resolvable:$true] %s135_s0 }
  0x47   : > { %p119_p3 = scmp.eq.s32.totalorder %s1315_s11, 0  ;;  %s126_s12 = sshrl.u32 %s1315_s11, 3 }
  0x48   : > { %s127_s13 = sand.u32 7, %s1315_s11   ;;  %s128_s15 = smul.u32 40, %s126_s12 }
  0x49   : > { %s1321_s14 = scalar_select %p119_p3, 1, 0 }
  0x4a   : > { %p746_p5 = scmp.ne.s32.totalorder %s1315_s11, 0  ;;  %s129_s29 = sadd.s32 %s128_s15, %s127_s13 }
  0x4b   : > { %s121_s20 = sadd.s32 %s1321_s14, %s1278_s5  ;;  %s130_s4 = scalar_lea.hbm %s1637_s1, %s129_s29 }
  0x4c   : > { %s133_s6 = sshll.u32 %s130_s4, 4  ;;  %s134_s6 = int_to_ptr.hbm [resolvable:$true] %s133_s6 }
  0x4d   : > { %s841_s22 = sshra.s32 %s134_s6, 4  ;;  %s842_s22 = int_to_ptr.hbm [resolvable:$true] %s841_s22 }
  0x4e   : > { %s843_s17 = scalar_lea.hbm %s842_s22, 5  ;;  %p848_p11 = scmp.lt.s32.totalorder %s842_s22, %s1637_s1 }
  0x4f   : > { %p844_p7 = scmp.ne.s32.totalorder %s842_s22, %s843_s17  ;;  %p849_p12 = scmp.lt.s32.totalorder %s1294_s21, %s843_s17 }
  0x51   : > { %p845_p8 = pnand %p844_p7, %p746_p5  ;;  %p850_p13 = por %p849_p12, %p848_p11 }
  0x53   : > { %p846_p10 = pneg %p845_p8 }
  0x55   : > { %p851_p0 = pnand %p850_p13, %p846_p10 }
  0x57   : > { %854 = shalt.err (!%p851_p0)  }
  0x58   : > { %s1667_s28 = smov 1   ;;  %s1668_s4 = smov 128  }
  0x59   : > { %701 = dma.hbm_to_vmem [thread:$0]  (%p746_p5), %s134_s6, 80, %s136_s0, [#allocation2 + $0x1], %s1668_s4, %s1668_s4, %s1667_s28 }
  0x5a   : > { %143 = sbr.rel (%p746_p5) target bundleno = 100 (0x64), region = 28 }
  0x5f   : > { %v144_v2 = vlaneseq  ;;  %v1195_v3 = vmov 0.0  }
  0x61   : > { %vm146_vm1 = vcmp.lt.s32.totalorder %v144_v2, 640 }
  0x62   : > { %645 = vst.msk [vmem:[%s1280_s7 + $0x1] ss:$8 sm:$0xf] %vm146_vm1, %v1195_v3 }
  0x63   : > { %646 = vst.msk [vmem:[%s1280_s7 + $0x1] ss:$8 sm:$0x10] %vm146_vm1, %v1195_v3 }
  0x64 PF: > { %s151_s17 = sadd.s32 2, %s1268_s26  ;;  %s165_s22 = scalar_lea.vmem %s1280_s7, 2 [#allocation6] }
  0x65   : > { %s1345_s19 = sld [smem:[#allocation5 + %s151_s17]]  ;;  %s169_s29 = sshll.u32 %s165_s22, 4  ;;  %s170_s29 = int_to_ptr.vmem [resolvable:$true] %s169_s29 }
  0x6b   : > { %p153_p1 = scmp.eq.s32.totalorder %s1345_s19, 0  ;;  %s160_s6 = sshrl.u32 %s1345_s19, 3 }
  0x6c   : > { %s161_s13 = sand.u32 7, %s1345_s19   ;;  %s162_s0 = smul.u32 40, %s160_s6 }
  0x6d   : > { %s154_s15 = scalar_select %p153_p1, 1, 0 }
  0x6e   : > { %p747_p2 = scmp.ne.s32.totalorder %s1345_s19, 0  ;;  %s163_s10 = sadd.s32 %s162_s0, %s161_s13 }
  0x6f   : > { %s1354_s30 = sadd.s32 %s154_s15, %s121_s20  ;;  %s164_s4 = scalar_lea.hbm %s1637_s1, %s163_s10 }
  0x70   : > { %s167_s17 = sshll.u32 %s164_s4, 4  ;;  %s168_s17 = int_to_ptr.hbm [resolvable:$true] %s167_s17 }
  0x71   : > { %s869_s24 = sshra.s32 %s168_s17, 4  ;;  %s870_s24 = int_to_ptr.hbm [resolvable:$true] %s869_s24 }
  0x72   : > { %s871_s16 = scalar_lea.hbm %s870_s24, 5  ;;  %p876_p10 = scmp.lt.s32.totalorder %s870_s24, %s1637_s1 }
  0x73   : > { %p872_p3 = scmp.ne.s32.totalorder %s870_s24, %s871_s16  ;;  %p877_p11 = scmp.lt.s32.totalorder %s1294_s21, %s871_s16 }
  0x75   : > { %p873_p7 = pnand %p872_p3, %p747_p2  ;;  %p878_p12 = por %p877_p11, %p876_p10 }
  0x77   : > { %p874_p8 = pneg %p873_p7 }
  0x79   : > { %p879_p13 = pnand %p878_p12, %p874_p8 }
  0x7b   : > { %882 = shalt.err (!%p879_p13)  }
  0x7c   : > { %s1669_s14 = smov 1   ;;  %s1670_s20 = smov 128  }
  0x7d   : > { %703 = dma.hbm_to_vmem [thread:$0]  (%p747_p2), %s168_s17, 80, %s170_s29, [#allocation2 + $0x2], %s1670_s20, %s1670_s20, %s1669_s14 }
  0x7e   : > { %177 = sbr.rel (%p747_p2) target bundleno = 136 (0x88), region = 36 }
  0x83   : > { %v178_v4 = vlaneseq  ;;  %v1196_v5 = vmov 0.0  }
  0x85   : > { %vm180_vm2 = vcmp.lt.s32.totalorder %v178_v4, 640 }
  0x86   : > { %649 = vst.msk [vmem:[%s1280_s7 + $0x2] ss:$8 sm:$0xf] %vm180_vm2, %v1196_v5 }
  0x87   : > { %650 = vst.msk [vmem:[%s1280_s7 + $0x2] ss:$8 sm:$0x10] %vm180_vm2, %v1196_v5 }
  0x88 PF: > { %s185_s16 = sadd.s32 3, %s1268_s26  ;;  %s199_s6 = scalar_lea.vmem %s1280_s7, 3 [#allocation6] }
  0x89   : > { %s1376_s24 = sld [smem:[#allocation5 + %s185_s16]]  ;;  %s203_s10 = sshll.u32 %s199_s6, 4  ;;  %s204_s10 = int_to_ptr.vmem [resolvable:$true] %s203_s10 }
  0x8f   : > { %p187_p0 = scmp.eq.s32.totalorder %s1376_s24, 0  ;;  %s194_s13 = sshrl.u32 %s1376_s24, 3 }
  0x90   : > { %s195_s15 = sand.u32 7, %s1376_s24   ;;  %s196_s29 = smul.u32 40, %s194_s13 }
  0x91   : > { %s1382_s0 = scalar_select %p187_p0, 1, 0 }
  0x92   : > { %p748_p1 = scmp.ne.s32.totalorder %s1376_s24, 0  ;;  %s197_s28 = sadd.s32 %s196_s29, %s195_s15 }
  0x93   : > { %s189_s12 = sadd.s32 %s1382_s0, %s1354_s30  ;;  %s198_s22 = scalar_lea.hbm %s1637_s1, %s197_s28 }
  0x94   : > { %s201_s5 = sshll.u32 %s198_s22, 4  ;;  %s202_s5 = int_to_ptr.hbm [resolvable:$true] %s201_s5 }
  0x95   : > { %s897_s14 = sshra.s32 %s202_s5, 4  ;;  %s898_s14 = int_to_ptr.hbm [resolvable:$true] %s897_s14 }
  0x96   : > { %s899_s20 = scalar_lea.hbm %s898_s14, 5  ;;  %p904_p10 = scmp.lt.s32.totalorder %s898_s14, %s1637_s1 }
  0x97   : > { %p900_p3 = scmp.ne.s32.totalorder %s898_s14, %s899_s20  ;;  %p905_p11 = scmp.lt.s32.totalorder %s1294_s21, %s899_s20 }
  0x99   : > { %p901_p7 = pnand %p900_p3, %p748_p1  ;;  %p906_p12 = por %p905_p11, %p904_p10 }
  0x9b   : > { %p902_p8 = pneg %p901_p7 }
  0x9d   : > { %p907_p13 = pnand %p906_p12, %p902_p8 }
  0x9f   : > { %910 = shalt.err (!%p907_p13)  }
  0xa0   : > { %s1671_s6 = smov 1   ;;  %s1672_s15 = smov 128  }
  0xa1   : > { %705 = dma.hbm_to_vmem [thread:$0]  (%p748_p1), %s202_s5, 80, %s204_s10, [#allocation2 + $0x3], %s1672_s15, %s1672_s15, %s1671_s6 }
  0xa2   : > { %211 = sbr.rel (%p748_p1) target bundleno = 172 (0xac), region = 44 }
  0xa7   : > { %v212_v6 = vlaneseq  ;;  %v1197_v7 = vmov 0.0  }
  0xa9   : > { %vm214_vm3 = vcmp.lt.s32.totalorder %v212_v6, 640 }
  0xaa   : > { %653 = vst.msk [vmem:[%s1280_s7 + $0x3] ss:$8 sm:$0xf] %vm214_vm3, %v1197_v7 }
  0xab   : > { %654 = vst.msk [vmem:[%s1280_s7 + $0x3] ss:$8 sm:$0x10] %vm214_vm3, %v1197_v7 }
  0xac PF: > { %s219_s29 = sadd.s32 4, %s1268_s26  ;;  %s233_s10 = scalar_lea.vmem %s1280_s7, 4 [#allocation6] }
  0xad   : > { %s1406_s28 = sld [smem:[#allocation5 + %s219_s29]]  ;;  %s237_s14 = sshll.u32 %s233_s10, 4  ;;  %s238_s14 = int_to_ptr.vmem [resolvable:$true] %s237_s14 }
  0xb3   : > { %p221_p0 = scmp.eq.s32.totalorder %s1406_s28, 0  ;;  %s228_s4 = sshrl.u32 %s1406_s28, 3 }
  0xb4   : > { %s229_s17 = sand.u32 7, %s1406_s28   ;;  %s230_s5 = smul.u32 40, %s228_s4 }
  0xb5   : > { %s222_s22 = scalar_select %p221_p0, 1, 0 }
  0xb6   : > { %p1649_p3 = scmp.ne.s32.totalorder %s1406_s28, 0  ;;  %s231_s16 = sadd.s32 %s230_s5, %s229_s17 }
  0xb7   : > { %s1415_s20 = sadd.s32 %s222_s22, %s189_s12  ;;  %s232_s15 = scalar_lea.hbm %s1637_s1, %s231_s16 }
  0xb8   : > { %s235_s29 = sshll.u32 %s232_s15, 4  ;;  %s236_s29 = int_to_ptr.hbm [resolvable:$true] %s235_s29 }
  0xb9   : > { %s925_s8 = sshra.s32 %s236_s29, 4  ;;  %s926_s8 = int_to_ptr.hbm [resolvable:$true] %s925_s8 }
  0xba   : > { %s927_s3 = scalar_lea.hbm %s926_s8, 5  ;;  %p932_p11 = scmp.lt.s32.totalorder %s926_s8, %s1637_s1 }
  0xbb   : > { %p928_p7 = scmp.ne.s32.totalorder %s926_s8, %s927_s3  ;;  %p933_p12 = scmp.lt.s32.totalorder %s1294_s21, %s927_s3 }
  0xbd   : > { %p929_p8 = pnand %p928_p7, %p1649_p3  ;;  %p934_p13 = por %p933_p12, %p932_p11 }
  0xbf   : > { %p930_p10 = pneg %p929_p8 }
  0xc1   : > { %p935_p0 = pnand %p934_p13, %p930_p10 }
  0xc3   : > { %938 = shalt.err (!%p935_p0)  }
  0xc4   : > { %s1673_s0 = smov 1   ;;  %s1674_s12 = smov 128  }
  0xc5   : > { %707 = dma.hbm_to_vmem [thread:$0]  (%p1649_p3), %s236_s29, 80, %s238_s14, [#allocation2 + $0x4], %s1674_s12, %s1674_s12, %s1673_s0 }
  0xc6   : > { %245 = sbr.rel (%p1649_p3) target bundleno = 208 (0xd0), region = 52 }
  0xcb   : > { %v246_v8 = vlaneseq  ;;  %v1198_v9 = vmov 0.0  }
  0xcd   : > { %vm248_vm4 = vcmp.lt.s32.totalorder %v246_v8, 640 }
  0xce   : > { %657 = vst.msk [vmem:[%s1280_s7 + $0x4] ss:$8 sm:$0xf] %vm248_vm4, %v1198_v9 }
  0xcf   : > { %658 = vst.msk [vmem:[%s1280_s7 + $0x4] ss:$8 sm:$0x10] %vm248_vm4, %v1198_v9 }
  0xd0 PF: > { %s253_s3 = sadd.s32 5, %s1268_s26  ;;  %s267_s4 = scalar_lea.vmem %s1280_s7, 5 [#allocation6] }
  0xd1   : > { %s1437_s8 = sld [smem:[#allocation5 + %s253_s3]]  ;;  %s271_s16 = sshll.u32 %s267_s4, 4  ;;  %s272_s16 = int_to_ptr.vmem [resolvable:$true] %s271_s16 }
  0xd7   : > { %p255_p7 = scmp.eq.s32.totalorder %s1437_s8, 0  ;;  %s262_s17 = sshrl.u32 %s1437_s8, 3 }
  0xd8   : > { %s263_s22 = sand.u32 7, %s1437_s8   ;;  %s264_s14 = smul.u32 40, %s262_s17 }
  0xd9   : > { %s1443_s5 = scalar_select %p255_p7, 1, 0 }
  0xda   : > { %p1653_p8 = scmp.ne.s32.totalorder %s1437_s8, 0  ;;  %s265_s6 = sadd.s32 %s264_s14, %s263_s22 }
  0xdb   : > { %s257_s13 = sadd.s32 %s1443_s5, %s1415_s20  ;;  %s266_s10 = scalar_lea.hbm %s1637_s1, %s265_s6 }
  0xdc   : > { %s269_s30 = sshll.u32 %s266_s10, 4  ;;  %s270_s30 = int_to_ptr.hbm [resolvable:$true] %s269_s30 }
  0xdd   : > { %s953_s0 = sshra.s32 %s270_s30, 4  ;;  %s954_s0 = int_to_ptr.hbm [resolvable:$true] %s953_s0 }
  0xde   : > { %s955_s12 = scalar_lea.hbm %s954_s0, 5  ;;  %p960_p13 = scmp.lt.s32.totalorder %s954_s0, %s1637_s1 }
  0xdf   : > { %p956_p10 = scmp.ne.s32.totalorder %s954_s0, %s955_s12  ;;  %p961_p0 = scmp.lt.s32.totalorder %s1294_s21, %s955_s12 }
  0xe1   : > { %p957_p11 = pnand %p956_p10, %p1653_p8  ;;  %p962_p7 = por %p961_p0, %p960_p13 }
  0xe3   : > { %p958_p12 = pneg %p957_p11 }
  0xe5   : > { %p963_p3 = pnand %p962_p7, %p958_p12 }
  0xe7   : > { %966 = shalt.err (!%p963_p3)  }
  0xe8   : > { %s1675_s4 = smov 1   ;;  %s1676_s22 = smov 128  }
  0xe9   : > { %709 = dma.hbm_to_vmem [thread:$0]  (%p1653_p8), %s270_s30, 80, %s272_s16, [#allocation2 + $0x5], %s1676_s22, %s1676_s22, %s1675_s4 }
  0xea   : > { %279 = sbr.rel (%p1653_p8) target bundleno = 244 (0xf4), region = 60 }
  0xef   : > { %v280_v10 = vlaneseq  ;;  %v1199_v11 = vmov 0.0  }
  0xf1   : > { %vm282_vm5 = vcmp.lt.s32.totalorder %v280_v10, 640 }
  0xf2   : > { %661 = vst.msk [vmem:[%s1280_s7 + $0x5] ss:$8 sm:$0xf] %vm282_vm5, %v1199_v11 }
  0xf3   : > { %662 = vst.msk [vmem:[%s1280_s7 + $0x5] ss:$8 sm:$0x10] %vm282_vm5, %v1199_v11 }
  0xf4 PF: > { %s287_s14 = sadd.s32 6, %s1268_s26  ;;  %s301_s16 = scalar_lea.vmem %s1280_s7, 6 [#allocation6] }
  0xf5   : > { %s1467_s6 = sld [smem:[#allocation5 + %s287_s14]]  ;;  %s305_s0 = sshll.u32 %s301_s16, 4  ;;  %s306_s0 = int_to_ptr.vmem [resolvable:$true] %s305_s0 }
  0xfb   : > { %p289_p3 = scmp.eq.s32.totalorder %s1467_s6, 0  ;;  %s296_s15 = sshrl.u32 %s1467_s6, 3 }
  0xfc   : > { %s297_s29 = sand.u32 7, %s1467_s6   ;;  %s298_s30 = smul.u32 40, %s296_s15 }
  0xfd   : > { %s290_s10 = scalar_select %p289_p3, 1, 0 }
  0xfe   : > { %p1654_p10 = scmp.ne.s32.totalorder %s1467_s6, 0  ;;  %s299_s3 = sadd.s32 %s298_s30, %s297_s29 }
  0xff   : > { %s1476_s12 = sadd.s32 %s290_s10, %s257_s13  ;;  %s300_s22 = scalar_lea.hbm %s1637_s1, %s299_s3 }
 0x100   : > { %s303_s14 = sshll.u32 %s300_s22, 4  ;;  %s304_s14 = int_to_ptr.hbm [resolvable:$true] %s303_s14 }
 0x101   : > { %s981_s2 = sshra.s32 %s304_s14, 4  ;;  %s982_s2 = int_to_ptr.hbm [resolvable:$true] %s981_s2 }
 0x102   : > { %s983_s23 = scalar_lea.hbm %s982_s2, 5  ;;  %p988_p0 = scmp.lt.s32.totalorder %s982_s2, %s1637_s1 }
 0x103   : > { %p984_p11 = scmp.ne.s32.totalorder %s982_s2, %s983_s23  ;;  %p989_p7 = scmp.lt.s32.totalorder %s1294_s21, %s983_s23 }
 0x105   : > { %p985_p12 = pnand %p984_p11, %p1654_p10  ;;  %p990_p3 = por %p989_p7, %p988_p0 }
 0x107   : > { %p986_p13 = pneg %p985_p12 }
 0x109   : > { %p991_p8 = pnand %p990_p3, %p986_p13 }
 0x10b   : > { %994 = shalt.err (!%p991_p8)  }
 0x10c   : > { %s1677_s5 = smov 1   ;;  %s1678_s13 = smov 128  }
 0x10d   : > { %711 = dma.hbm_to_vmem [thread:$0]  (%p1654_p10), %s304_s14, 80, %s306_s0, [#allocation2 + $0x6], %s1678_s13, %s1678_s13, %s1677_s5 }
 0x10e   : > { %313 = sbr.rel (%p1654_p10) target bundleno = 280 (0x118), region = 68 }
 0x113   : > { %v314_v12 = vlaneseq  ;;  %v1200_v13 = vmov 0.0  }
 0x115   : > { %vm316_vm6 = vcmp.lt.s32.totalorder %v314_v12, 640 }
 0x116   : > { %665 = vst.msk [vmem:[%s1280_s7 + $0x6] ss:$8 sm:$0xf] %vm316_vm6, %v1200_v13 }
 0x117   : > { %666 = vst.msk [vmem:[%s1280_s7 + $0x6] ss:$8 sm:$0x10] %vm316_vm6, %v1200_v13 }
 0x118 PF: > { %s321_s2 = sadd.s32 7, %s1268_s26  ;;  %s335_s15 = scalar_lea.vmem %s1280_s7, 7 [#allocation6] }
 0x119   : > { %s1498_s23 = sld [smem:[#allocation5 + %s321_s2]]  ;;  %s339_s3 = sshll.u32 %s335_s15, 4  ;;  %s340_s3 = int_to_ptr.vmem [resolvable:$true] %s339_s3 }
 0x11f   : > { %p323_p8 = scmp.eq.s32.totalorder %s1498_s23, 0  ;;  %s330_s29 = sshrl.u32 %s1498_s23, 3 }
 0x120   : > { %s331_s10 = sand.u32 7, %s1498_s23   ;;  %s332_s0 = smul.u32 40, %s330_s29 }
 0x121   : > { %s324_s30 = scalar_select %p323_p8, 1, 0 }
 0x122   : > { %p1655_p11 = scmp.ne.s32.totalorder %s1498_s23, 0  ;;  %s333_s4 = sadd.s32 %s332_s0, %s331_s10 }
 0x123   : > { %s1505_s17 = sadd.s32 %s324_s30, %s1476_s12  ;;  %s334_s16 = scalar_lea.hbm %s1637_s1, %s333_s4 }
 0x124   : > { %s337_s20 = sshll.u32 %s334_s16, 4  ;;  %s338_s20 = int_to_ptr.hbm [resolvable:$true] %s337_s20 }
 0x125   : > { %s1009_s5 = sshra.s32 %s338_s20, 4  ;;  %s1010_s5 = int_to_ptr.hbm [resolvable:$true] %s1009_s5 }
 0x126   : > { %s1011_s13 = scalar_lea.hbm %s1010_s5, 5  ;;  %p1016_p7 = scmp.lt.s32.totalorder %s1010_s5, %s1637_s1 }
 0x127   : > { %p1012_p12 = scmp.ne.s32.totalorder %s1010_s5, %s1011_s13  ;;  %p1017_p3 = scmp.lt.s32.totalorder %s1294_s21, %s1011_s13 }
 0x129   : > { %p1013_p13 = pnand %p1012_p12, %p1655_p11  ;;  %p1018_p8 = por %p1017_p3, %p1016_p7 }
 0x12b   : > { %p1014_p0 = pneg %p1013_p13 }
 0x12d   : > { %p1019_p10 = pnand %p1018_p8, %p1014_p0 }
 0x12f   : > { %1022 = shalt.err (!%p1019_p10)  }
 0x130   : > { %s1679_s12 = smov 1   ;;  %s1680_s29 = smov 128  }
 0x131   : > { %713 = dma.hbm_to_vmem [thread:$0]  (%p1655_p11), %s338_s20, 80, %s340_s3, [#allocation2 + $0x7], %s1680_s29, %s1680_s29, %s1679_s12 }
 0x132   : > { %347 = sbr.rel (%p1655_p11) target bundleno = 316 (0x13c), region = 76 }
 0x137   : > { %v348_v14 = vlaneseq  ;;  %v1201_v15 = vmov 0.0  }
 0x139   : > { %vm350_vm7 = vcmp.lt.s32.totalorder %v348_v14, 640 }
 0x13a   : > { %669 = vst.msk [vmem:[%s1280_s7 + $0x7] ss:$8 sm:$0xf] %vm350_vm7, %v1201_v15 }
 0x13b   : > { %670 = vst.msk [vmem:[%s1280_s7 + $0x7] ss:$8 sm:$0x10] %vm350_vm7, %v1201_v15 }
 0x13c PF: > { %s355_s10 = ssub.s32 8, %s1505_s17  ;;  %s357_s30 = ssub.s32 7, %s1505_s17 }
 0x13d   : > { %p356_p10 = scmp.gt.s32.totalorder %s355_s10, 0  ;;  %s372_s4 = sshll.u32 %s1308_s9, 4  ;;  %s1534_s4 = int_to_ptr.vmem [resolvable:$true] %s372_s4 }
 0x13f   : > { %s1701_s30 = smov (!%p356_p10, %s357_s30), 7 }
 0x140   : > { %s359_s0 = sadd.s32 %s1268_s26, %s1701_s30 }
 0x141   : > { %s1529_s3 = sld [smem:[#allocation5 + %s359_s0]] }
 0x147   : > { %s365_s22 = sshrl.u32 %s1529_s3, 3  ;;  %s366_s7 = sand.u32 7, %s1529_s3  }
 0x148   : > { %s367_s14 = smul.u32 40, %s365_s22  ;;  %p753_p12 = scmp.ne.s32.totalorder %s1529_s3, 0 }
 0x14a   : > { %s368_s16 = sadd.s32 %s367_s14, %s366_s7 }
 0x14b   : > { %s369_s5 = scalar_lea.hbm %s1637_s1, %s368_s16 }
 0x14c   : > { %s370_s26 = sshll.u32 %s369_s5, 4  ;;  %s371_s26 = int_to_ptr.hbm [resolvable:$true] %s370_s26 }
 0x14d   : > { %s1037_s13 = sshra.s32 %s371_s26, 4  ;;  %s1038_s13 = int_to_ptr.hbm [resolvable:$true] %s1037_s13 }
 0x14e   : > { %s1039_s2 = scalar_lea.hbm %s1038_s13, 5  ;;  %p1044_p3 = scmp.lt.s32.totalorder %s1038_s13, %s1637_s1 }
 0x14f   : > { %p1040_p13 = scmp.ne.s32.totalorder %s1038_s13, %s1039_s2  ;;  %p1045_p8 = scmp.lt.s32.totalorder %s1294_s21, %s1039_s2 }
 0x151   : > { %p1041_p0 = pnand %p1040_p13, %p753_p12  ;;  %p1046_p10 = por %p1045_p8, %p1044_p3 }
 0x153   : > { %p1042_p7 = pneg %p1041_p0 }
 0x155   : > { %p1047_p11 = pnand %p1046_p10, %p1042_p7 }
 0x157   : > { %1050 = shalt.err (!%p1047_p11)  }
 0x158   : > { %s1202_s29 = smov 16   ;;  %s1681_s10 = smov 1  }
 0x159   : > { %s1682_s30 = smov 128   ;;  %381 = sbr.rel (%p753_p12) target bundleno = 354 (0x162), region = 84 }
 0x15a   : > { %715 = dma.hbm_to_vmem [thread:$0]  (%p753_p12), %s371_s26, 80, %s1534_s4, [#allocation3], %s1682_s30, %s1202_s29, %s1681_s10 }
 0x15e   : > { %v382_v16 = vlaneseq  ;;  %v1203_v17 = vmov 0.0  }
 0x160   : > { %vm384_vm8 = vcmp.lt.s32.totalorder %v382_v16, 640 }
 0x161   : > { %386 = vst.msk [vmem:[%s1308_s9] sm:$0x1f] %vm384_vm8, %v1203_v17 }
 0x162 PF: > { %1136 = dma.done.wait (%p745_p9), [#allocation2], 80 }
 0x163   : > { %1138 = vsyncadd (%p745_p9), [#allocation2], 4294967216 }
 0x164   : > { %1140 = dma.done.wait (%p746_p5), [#allocation2 + $0x1], 80 }
 0x165   : > { %1142 = vsyncadd (%p746_p5), [#allocation2 + $0x1], 4294967216 }
 0x166   : > { %1144 = dma.done.wait (%p747_p2), [#allocation2 + $0x2], 80 }
 0x167   : > { %1146 = vsyncadd (%p747_p2), [#allocation2 + $0x2], 4294967216 }
 0x168   : > { %1148 = dma.done.wait (%p748_p1), [#allocation2 + $0x3], 80 }
 0x169   : > { %1150 = vsyncadd (%p748_p1), [#allocation2 + $0x3], 4294967216  ;;  %p1683_p9 = scmp.ne.s32.totalorder %s1406_s28, 0 }
 0x16b   : > { %1152 = dma.done.wait (%p1683_p9), [#allocation2 + $0x4], 80  ;;  %p1684_p11 = pmov %p1683_p9 }
 0x16c   : > { %p1685_p5 = scmp.ne.s32.totalorder %s1437_s8, 0 }
 0x16d   : > { %1154 = vsyncadd (%p1684_p11), [#allocation2 + $0x4], 4294967216 }
 0x16e   : > { %1156 = dma.done.wait (%p1685_p5), [#allocation2 + $0x5], 80  ;;  %p1686_p13 = pmov %p1685_p5 }
 0x16f   : > { %p1687_p2 = scmp.ne.s32.totalorder %s1467_s6, 0 }
 0x170   : > { %1158 = vsyncadd (%p1686_p13), [#allocation2 + $0x5], 4294967216 }
 0x171   : > { %1160 = dma.done.wait (%p1687_p2), [#allocation2 + $0x6], 80  ;;  %p1688_p0 = pmov %p1687_p2 }
 0x172   : > { %p1689_p1 = scmp.ne.s32.totalorder %s1498_s23, 0 }
 0x173   : > { %1162 = vsyncadd (%p1688_p0), [#allocation2 + $0x6], 4294967216 }
 0x174   : > { %1164 = dma.done.wait (%p1689_p1), [#allocation2 + $0x7], 80  ;;  %p1690_p7 = pmov %p1689_p1 }
 0x176   : > { %1166 = vsyncadd (%p1690_p7), [#allocation2 + $0x7], 4294967216 }
 0x177   : > { %1168 = dma.done.wait (%p753_p12), [#allocation3], 80 }
 0x178   : > { %1170 = vsyncadd (%p753_p12), [#allocation3], 4294967216  ;;  %s696_s21 = smul.u32 40, %s1189_s18  ;;  %s1692_s24 = sld [smem:[#allocation38_spill]] }
 0x179   : > { %s697_s9 = smul.u32 5, %s1189_s18  ;;  %s1693_s0 = sld [smem:[#allocation39_spill]] }
 0x17a   : > { %s440_s14 = scalar_lea.sflag [#allocation7], %s1265_s25 }
 0x17e   : > { %s456_s28 = scalar_lea.hbm %s1692_s24, %s696_s21  ;;  %s1085_s5 = scalar_lea.hbm %s1692_s24, 80 }
 0x17f   : > { %s460_s8 = sshll.u32 %s456_s28, 4  ;;  %s470_s22 = scalar_lea.hbm %s1693_s0, %s697_s9  ;;  %s461_s8 = int_to_ptr.hbm [resolvable:$true] %s460_s8 }
 0x180   : > { %s474_s7 = sshll.u32 %s470_s22, 4  ;;  %s1079_s3 = sshra.s32 %s461_s8, 4  ;;  %s1080_s3 = int_to_ptr.hbm [resolvable:$true] %s1079_s3  ;;  %s475_s7 = int_to_ptr.hbm [resolvable:$true] %s474_s7 }
 0x181   : > { %s1081_s16 = scalar_lea.hbm %s1080_s3, 40  ;;  %p1086_p10 = scmp.lt.s32.totalorder %s1080_s3, %s1692_s24 }
 0x182   : > { %p1082_p12 = scmp.ne.s32.totalorder %s1080_s3, %s1081_s16  ;;  %p1087_p9 = scmp.lt.s32.totalorder %s1085_s5, %s1081_s16 }
 0x184   : > { %p1083_p3 = pnand %p1082_p12, %p1255_p4  ;;  %p1088_p11 = por %p1087_p9, %p1086_p10 }
 0x186   : > { %p1084_p8 = pneg %p1083_p3 }
 0x188   : > { %p1089_p5 = pnand %p1088_p11, %p1084_p8 }
 0x18a   : > { %1092 = shalt.err (!%p1089_p5)
}
 0x18b   : > { %s1694_s2 = sld [smem:[#allocation37_spill]]  ;;  %s445_s15 = scalar_lea.sflag [#allocation9], %s1265_s25 }
 0x18c   : > { %s1107_s12 = sshra.s32 %s475_s7, 4  ;;  %s1113_s21 = scalar_lea.hbm %s1693_s0, 10  ;;  %s1108_s12 = int_to_ptr.hbm [resolvable:$true] %s1107_s12 }
 0x18d   : > { %s1109_s29 = scalar_lea.hbm %s1108_s12, 5  ;;  %p1114_p1 = scmp.lt.s32.totalorder %s1108_s12, %s1693_s0 }
 0x18e   : > { %p1110_p13 = scmp.ne.s32.totalorder %s1108_s12, %s1109_s29  ;;  %p1115_p7 = scmp.lt.s32.totalorder %s1113_s21, %s1109_s29 }
 0x190   : > { %p1111_p2 = pnand %p1110_p13, %p1255_p4  ;;  %p1116_p12 = por %p1115_p7, %p1114_p1 }
 0x191   : > { %734 = dma.vmem_to_hbm [thread:$0]  (%p1255_p4), %s1694_s2, 640, %s461_s8, %s440_s14  }
 0x192   : > { %p1112_p0 = pneg %p1111_p2 }
 0x194   : > { %p1117_p3 = pnand %p1116_p12, %p1112_p0 }
 0x196   : > { %1120 = shalt.err (!%p1117_p3)
}
 0x197   : > { %735 = dma.vmem_to_hbm [thread:$0]  (%p1255_p4), %s1534_s4, 80, %s475_s7, %s445_s15  }
 0x198 PF: > { %s1695_s25 = sld [smem:[#allocation31_spill]]  ;;  %p763_p8 = scmp.ge.s32.totalorder %s1189_s18, 1 }
 0x19a   : > { %p739_p10 = pnand %p763_p8, %p1259_p6 }
 0x19c   : > { %p740_p9 = pneg %p739_p10 }
 0x19e   : > { %s486_s28 = sand.u32 1, %s1695_s25  }
 0x19f   : > { %s487_s8 = scalar_lea.sflag [#allocation7], %s486_s28 }
 0x1a0   : > { %1172 = dma.done.wait (%p740_p9), %s487_s8, 640  }
 0x1a1   : > { %1174 = vsyncadd (%p740_p9), %s487_s8, 4294966656  ;;  %s497_s6 = scalar_lea.sflag [#allocation9], %s486_s28 }
 0x1a2   : > { %1176 = dma.done.wait (%p740_p9), %s497_s6, 80  }
 0x1a3   : > { %1178 = vsyncadd (%p740_p9), %s497_s6, 4294967216  ;;  %s1697_s18 = sld [smem:[#allocation33_spill]] }
 0x1a4   : > { %s1698_s16 = sld [smem:[#allocation32_spill]] }
 0x1a5   : > { %s1699_s17 = sld [smem:[#allocation34_spill]] }
 0x1a9   : > { %p25_p4 = scmp.ge.s32.totalorder %s1697_s18, 3  }
 0x1ab   :  { %27 = sbr.rel (!%p25_p4) target bundleno = 12 (0xc), region = 213 }
 0x1b0   :  { %503 = vsyncpa [#allocation7], 1 }
 0x1b1   :  { %505 = vsyncpa [#allocation7 + $0x1], 1 }
 0x1b2   :  { %506 = vsyncpa [#allocation9], 1 }
 0x1b3   :  { %508 = vsyncpa [#allocation9 + $0x1], 1 }
 0x1b4   :  { %509 = vsyncmov [#allocation2] }
 0x1b7   :  { %s510_s4 = vpop.sfrf %509 }
 0x1b8   :  { %p685_p6 = scmp.ne.s32.totalorder %s510_s4, 0 }
 0x1ba   :  { %514 = shalt.err (%p685_p6)  }
 0x1bb   :  { %516 = vsyncmov [#allocation2 + $0x1] }
 0x1be   :  { %s517_s27 = vpop.sfrf %516 }
 0x1bf   :  { %p686_p11 = scmp.ne.s32.totalorder %s517_s27, 0 }
 0x1c1   :  { %521 = shalt.err (%p686_p11)  }
 0x1c2   :  { %523 = vsyncmov [#allocation2 + $0x2] }
 0x1c5   :  { %s524_s23 = vpop.sfrf %523 }
 0x1c6   :  { %p687_p5 = scmp.ne.s32.totalorder %s524_s23, 0 }
 0x1c8   :  { %528 = shalt.err (%p687_p5)  }
 0x1c9   :  { %530 = vsyncmov [#allocation2 + $0x3] }
 0x1cc   :  { %s531_s22 = vpop.sfrf %530 }
 0x1cd   :  { %p688_p13 = scmp.ne.s32.totalorder %s531_s22, 0 }
 0x1cf   :  { %535 = shalt.err (%p688_p13)  }
 0x1d0   :  { %537 = vsyncmov [#allocation2 + $0x4] }
 0x1d3   :  { %s538_s1 = vpop.sfrf %537 }
 0x1d4   :  { %p689_p2 = scmp.ne.s32.totalorder %s538_s1, 0 }
 0x1d6   :  { %542 = shalt.err (%p689_p2)  }
 0x1d7   :  { %544 = vsyncmov [#allocation2 + $0x5] }
 0x1da   :  { %s545_s18 = vpop.sfrf %544 }
 0x1db   :  { %p690_p0 = scmp.ne.s32.totalorder %s545_s18, 0 }
 0x1dd   :  { %549 = shalt.err (%p690_p0)  }
 0x1de   :  { %551 = vsyncmov [#allocation2 + $0x6] }
 0x1e1   :  { %s552_s24 = vpop.sfrf %551 }
 0x1e2   :  { %p691_p1 = scmp.ne.s32.totalorder %s552_s24, 0 }
 0x1e4   :  { %556 = shalt.err (%p691_p1)  }
 0x1e5   :  { %558 = vsyncmov [#allocation2 + $0x7] }
 0x1e8   :  { %s559_s0 = vpop.sfrf %558 }
 0x1e9   :  { %p692_p7 = scmp.ne.s32.totalorder %s559_s0, 0 }
 0x1eb   :  { %563 = shalt.err (%p692_p7)  }
 0x1ec   :  { %564 = vsyncmov [#allocation3] }
 0x1ef   :  { %s565_s7 = vpop.sfrf %564 }
 0x1f0   :  { %p693_p12 = scmp.ne.s32.totalorder %s565_s7, 0 }
 0x1f2   :  { %569 = shalt.err (%p693_p12)  }

</bundles_post_ra>
